<compile_context>
chip_gen: v7x
topology: tpu7x:2x2x1
jax: 0.10.0
libtpu: 0.0.40
codegen_flags: <defaults>
</compile_context>

<pallas_src>
import jax
import jax.numpy as jnp
import numpy as np
from jax.experimental import pallas as pl
from jax.experimental.pallas import tpu as pltpu

INPUT_SIZE = 8
HIDDEN_SIZE = 64
NUM_LAYERS = 2
OUTPUT_SIZE = 1


# ----------------------------- Pallas kernel -------------------------------

def _lstm_recurrence(gpre_ref, whh_ref, S, B, H, hseq_ref=None):
    """Serial LSTM recurrence.

    gpre_ref: (S*B, 4H) VMEM scratch holding x@W_ih + (b_ih+b_hh) for all steps.
    whh_ref:  (H, 4H) recurrent weight (pre-transposed).
    Optionally stores each step's hidden state into hseq_ref ((S*B, H) scratch)
    so it can feed the next layer's hoisted input projection.
    Returns the final hidden state (B, H).
    """
    whh = whh_ref[...]                               # hoist weight load out of loop
    h = jnp.zeros((B, H), jnp.float32)
    c = jnp.zeros((B, H), jnp.float32)
    for t in range(S):                               # static, fully unrolled time loop
        g = gpre_ref[t * B:(t + 1) * B, :] + jnp.dot(
            h, whh, preferred_element_type=jnp.float32)       # (B, 4H)
        i_g = jax.nn.sigmoid(g[:, 0 * H:1 * H])
        f_g = jax.nn.sigmoid(g[:, 1 * H:2 * H])
        g_g = jnp.tanh(g[:, 2 * H:3 * H])
        o_g = jax.nn.sigmoid(g[:, 3 * H:4 * H])
        c = f_g * c + i_g * g_g
        h = o_g * jnp.tanh(c)
        if hseq_ref is not None:
            hseq_ref[t * B:(t + 1) * B, :] = h
    return h


def make_fused_kernel(S, B, H):
    """Whole model (LSTM layer 0 -> LSTM layer 1 -> FC) in one kernel."""

    def kernel(x_ref, wih0_ref, whh0_ref, b0_ref,
               wih1_ref, whh1_ref, b1_ref,
               fcw_ref, fcb_ref, out_ref, gpre_sc, hseq_sc):
        # ---- layer 0: hoisted input projection (one (S*B,D)x(D,4H) matmul) ----
        gpre_sc[...] = (
            jnp.dot(x_ref[...], wih0_ref[...],
                    preferred_element_type=jnp.float32)
            + b0_ref[...]
        )
        _lstm_recurrence(gpre_sc, whh0_ref, S, B, H, hseq_ref=hseq_sc)

        # ---- layer 1: hoisted input projection over layer-0's full sequence ----
        gpre_sc[...] = (
            jnp.dot(hseq_sc[...], wih1_ref[...],
                    preferred_element_type=jnp.float32)
            + b1_ref[...]
        )
        h_last = _lstm_recurrence(gpre_sc, whh1_ref, S, B, H)

        # ---- final Linear on the last time step, fused into the same kernel ----
        out_ref[...] = (
            jnp.dot(h_last, fcw_ref[...],
                    preferred_element_type=jnp.float32)
            + fcb_ref[...]
        )

    return kernel


# ------------------------------- wrapper ------------------------------------

def lstm_model_forward(x, params):
    """x: (B, S, D_in) batch_first, like the PyTorch module. Returns (B, 1)."""
    B, S, D = x.shape
    H = HIDDEN_SIZE
    B_pad = max(8, ((B + 7) // 8) * 8)               # sublane-dense batch

    # time-major, pad batch rows with zeros, flatten to (S*B_pad, D)
    x_tm = jnp.transpose(x, (1, 0, 2)).astype(jnp.float32)       # (S, B, D)
    x_tm = jnp.pad(x_tm, ((0, 0), (0, B_pad - B), (0, 0)))        # (S, B_pad, D)
    x_flat = x_tm.reshape(S * B_pad, D)

    (wih0, whh0, b0), (wih1, whh1, b1) = params["lstm"]

    out_pad = pl.pallas_call(
        make_fused_kernel(S, B_pad, H),
        out_shape=jax.ShapeDtypeStruct((B_pad, OUTPUT_SIZE), jnp.float32),
        scratch_shapes=[
            pltpu.VMEM((S * B_pad, 4 * H), jnp.float32),  # gate pre-activations
            pltpu.VMEM((S * B_pad, H), jnp.float32),      # layer-0 hidden sequence
        ],
    )(x_flat, wih0, whh0, b0, wih1, whh1, b1,
      params["fc_w_t"], params["fc_b"])

    return out_pad[:B]                                # drop padded batch rows


# ------------------------- deterministic parameters -------------------------

def init_params(key):
    k = 1.0 / np.sqrt(HIDDEN_SIZE)
    params = {"lstm": []}
    for layer in range(NUM_LAYERS):
        d_in = INPUT_SIZE if layer == 0 else HIDDEN_SIZE
        key, k1, k2, k3, k4 = jax.random.split(key, 5)
        w_ih = jax.random.uniform(k1, (4 * HIDDEN_SIZE, d_in), jnp.float32, -k, k)
        w_hh = jax.random.uniform(k2, (4 * HIDDEN_SIZE, HIDDEN_SIZE), jnp.float32, -k, k)
        b_ih = jax.random.uniform(k3, (4 * HIDDEN_SIZE,), jnp.float32, -k, k)
        b_hh = jax.random.uniform(k4, (4 * HIDDEN_SIZE,), jnp.float32, -k, k)
        params["lstm"].append(
            (w_ih.T, w_hh.T, (b_ih + b_hh).reshape(1, 4 * HIDDEN_SIZE)))
    key, k1, k2 = jax.random.split(key, 3)
    fc_w = jax.random.uniform(k1, (OUTPUT_SIZE, HIDDEN_SIZE), jnp.float32, -k, k)
    fc_b = jax.random.uniform(k2, (OUTPUT_SIZE,), jnp.float32, -k, k)
    params["fc_w_t"] = fc_w.T
    params["fc_b"] = fc_b.reshape(1, OUTPUT_SIZE)
    return params


# ----------------------------- pure-JAX reference ---------------------------

def reference_forward(x, params):
    B = x.shape[0]
    H = HIDDEN_SIZE
    seq = jnp.transpose(x, (1, 0, 2)).astype(jnp.float32)
    for layer in range(NUM_LAYERS):
        wih_t, whh_t, b = params["lstm"][layer]
        h = jnp.zeros((B, H), jnp.float32)
        c = jnp.zeros((B, H), jnp.float32)
        outs = []
        for t in range(seq.shape[0]):
            gates = seq[t] @ wih_t + h @ whh_t + b
            i_g = jax.nn.sigmoid(gates[:, 0 * H:1 * H])
            f_g = jax.nn.sigmoid(gates[:, 1 * H:2 * H])
            g_g = jnp.tanh(gates[:, 2 * H:3 * H])
            o_g = jax.nn.sigmoid(gates[:, 3 * H:4 * H])
            c = f_g * c + i_g * g_g
            h = o_g * jnp.tanh(c)
            outs.append(h)
        seq = jnp.stack(outs, axis=0)
    return seq[-1] @ params["fc_w_t"] + params["fc_b"]


# ----------------------------------- main -----------------------------------

if __name__ == "__main__":
    key = jax.random.PRNGKey(0)
    key, pkey, xkey = jax.random.split(key, 3)
    params = init_params(pkey)

    batch, seq_len = 2, 8
    x = jax.random.normal(xkey, (batch, seq_len, INPUT_SIZE), jnp.float32)

    out = jax.block_until_ready(lstm_model_forward(x, params))
    assert out.shape == (batch, OUTPUT_SIZE)

    ref = jax.block_until_ready(reference_forward(x, params))
    np.testing.assert_allclose(np.asarray(out), np.asarray(ref),
                               rtol=1e-3, atol=1e-3)

    print("KERNEL_OK")
</pallas_src>

<mosaic_0001>
module attributes {stable_mosaic.version = 11 : i64} {
  func.func @kernel(%arg0: memref<64x8xf32, #tpu.memory_space<vmem>>, %arg1: memref<8x256xf32, #tpu.memory_space<vmem>>, %arg2: memref<64x256xf32, #tpu.memory_space<vmem>>, %arg3: memref<1x256xf32, #tpu.memory_space<vmem>>, %arg4: memref<64x256xf32, #tpu.memory_space<vmem>>, %arg5: memref<64x256xf32, #tpu.memory_space<vmem>>, %arg6: memref<1x256xf32, #tpu.memory_space<vmem>>, %arg7: memref<64x1xf32, #tpu.memory_space<vmem>>, %arg8: memref<1x1xf32, #tpu.memory_space<vmem>>, %arg9: memref<8x1xf32, #tpu.memory_space<vmem>>, %arg10: memref<64x256xf32, #tpu.memory_space<vmem>>, %arg11: memref<64x64xf32, #tpu.memory_space<vmem>>) attributes {dimension_semantics = [], scalar_prefetch = 0 : i64, scratch_operands = 2 : i64, tpu.core_type = #tpu.core_type<tc>} {
    %c0 = arith.constant 0 : index
    %c0_0 = arith.constant 0 : index
    %0 = vector.load %arg0[%c0, %c0_0] : memref<64x8xf32, #tpu.memory_space<vmem>>, vector<64x8xf32>
    %c0_1 = arith.constant 0 : index
    %c0_2 = arith.constant 0 : index
    %1 = vector.load %arg1[%c0_1, %c0_2] : memref<8x256xf32, #tpu.memory_space<vmem>>, vector<8x256xf32>
    %cst = arith.constant dense<0.000000e+00> : vector<64x256xf32>
    %2 = tpu.matmul %0, %1, %cst {dimension_numbers = #tpu.dot_dimension_numbers<[1], [0], [0], [1], [0, 0, 1, 1], [], []>} : vector<64x8xf32>, vector<8x256xf32>, vector<64x256xf32> -> vector<64x256xf32>
    %c0_3 = arith.constant 0 : index
    %c0_4 = arith.constant 0 : index
    %3 = vector.load %arg3[%c0_3, %c0_4] : memref<1x256xf32, #tpu.memory_space<vmem>>, vector<1x256xf32>
    %4 = vector.broadcast %3 : vector<1x256xf32> to vector<64x256xf32>
    %5 = arith.addf %2, %4 : vector<64x256xf32>
    %c0_5 = arith.constant 0 : index
    %c0_6 = arith.constant 0 : index
    %6 = vector.load %arg10[%c0_5, %c0_6] : memref<64x256xf32, #tpu.memory_space<vmem>>, vector<64x256xf32>
    tpu.vector_store %arg10[%c0_5, %c0_6], %5 {strides = array<i32>} : memref<64x256xf32, #tpu.memory_space<vmem>>, vector<64x256xf32>,
    %c0_7 = arith.constant 0 : index
    %c0_8 = arith.constant 0 : index
    %7 = vector.load %arg2[%c0_7, %c0_8] : memref<64x256xf32, #tpu.memory_space<vmem>>, vector<64x256xf32>
    %cst_9 = arith.constant 0.000000e+00 : f32
    %8 = vector.broadcast %cst_9 : f32 to vector<8x64xf32>
    %cst_10 = arith.constant 0.000000e+00 : f32
    %9 = vector.broadcast %cst_10 : f32 to vector<8x64xf32>
    %c0_11 = arith.constant 0 : index
    %c0_12 = arith.constant 0 : index
    %10 = vector.load %arg10[%c0_11, %c0_12] : memref<64x256xf32, #tpu.memory_space<vmem>>, vector<8x256xf32>
    %cst_13 = arith.constant dense<0.000000e+00> : vector<8x256xf32>
    %11 = tpu.matmul %8, %7, %cst_13 {dimension_numbers = #tpu.dot_dimension_numbers<[1], [0], [0], [1], [0, 0, 1, 1], [], []>} : vector<8x64xf32>, vector<64x256xf32>, vector<8x256xf32> -> vector<8x256xf32>
    %12 = arith.addf %10, %11 : vector<8x256xf32>
    %13 = vector.extract_strided_slice %12 {offsets = [0, 0], sizes = [8, 64], strides = [1, 1]} : vector<8x256xf32> to vector<8x64xf32>
    %14 = arith.negf %13 : vector<8x64xf32>
    %15 = math.exp %14 : vector<8x64xf32>
    %cst_14 = arith.constant 1.000000e+00 : f32
    %16 = vector.broadcast %cst_14 : f32 to vector<8x64xf32>
    %17 = arith.addf %16, %15 : vector<8x64xf32>
    %18 = arith.divf %16, %17 : vector<8x64xf32>
    %19 = vector.extract_strided_slice %12 {offsets = [0, 64], sizes = [8, 64], strides = [1, 1]} : vector<8x256xf32> to vector<8x64xf32>
    %20 = arith.negf %19 : vector<8x64xf32>
    %21 = math.exp %20 : vector<8x64xf32>
    %cst_15 = arith.constant 1.000000e+00 : f32
    %22 = vector.broadcast %cst_15 : f32 to vector<8x64xf32>
    %23 = arith.addf %22, %21 : vector<8x64xf32>
    %24 = arith.divf %22, %23 : vector<8x64xf32>
    %25 = vector.extract_strided_slice %12 {offsets = [0, 128], sizes = [8, 64], strides = [1, 1]} : vector<8x256xf32> to vector<8x64xf32>
    %26 = math.tanh %25 : vector<8x64xf32>
    %27 = vector.extract_strided_slice %12 {offsets = [0, 192], sizes = [8, 64], strides = [1, 1]} : vector<8x256xf32> to vector<8x64xf32>
    %28 = arith.negf %27 : vector<8x64xf32>
    %29 = math.exp %28 : vector<8x64xf32>
    %cst_16 = arith.constant 1.000000e+00 : f32
    %30 = vector.broadcast %cst_16 : f32 to vector<8x64xf32>
    %31 = arith.addf %30, %29 : vector<8x64xf32>
    %32 = arith.divf %30, %31 : vector<8x64xf32>
    %33 = arith.mulf %24, %9 : vector<8x64xf32>
    %34 = arith.mulf %18, %26 : vector<8x64xf32>
    %35 = arith.addf %33, %34 : vector<8x64xf32>
    %36 = math.tanh %35 : vector<8x64xf32>
    %37 = arith.mulf %32, %36 : vector<8x64xf32>
    %c0_17 = arith.constant 0 : index
    %c0_18 = arith.constant 0 : index
    %38 = vector.load %arg11[%c0_17, %c0_18] : memref<64x64xf32, #tpu.memory_space<vmem>>, vector<8x64xf32>
    tpu.vector_store %arg11[%c0_17, %c0_18], %37 {strides = array<i32>} : memref<64x64xf32, #tpu.memory_space<vmem>>, vector<8x64xf32>,
    %c8 = arith.constant 8 : index
    %c0_19 = arith.constant 0 : index
    %39 = vector.load %arg10[%c8, %c0_19] : memref<64x256xf32, #tpu.memory_space<vmem>>, vector<8x256xf32>
    %cst_20 = arith.constant dense<0.000000e+00> : vector<8x256xf32>
    %40 = tpu.matmul %37, %7, %cst_20 {dimension_numbers = #tpu.dot_dimension_numbers<[1], [0], [0], [1], [0, 0, 1, 1], [], []>} : vector<8x64xf32>, vector<64x256xf32>, vector<8x256xf32> -> vector<8x256xf32>
    %41 = arith.addf %39, %40 : vector<8x256xf32>
    %42 = vector.extract_strided_slice %41 {offsets = [0, 0], sizes = [8, 64], strides = [1, 1]} : vector<8x256xf32> to vector<8x64xf32>
    %43 = arith.negf %42 : vector<8x64xf32>
    %44 = math.exp %43 : vector<8x64xf32>
    %cst_21 = arith.constant 1.000000e+00 : f32
    %45 = vector.broadcast %cst_21 : f32 to vector<8x64xf32>
    %46 = arith.addf %45, %44 : vector<8x64xf32>
    %47 = arith.divf %45, %46 : vector<8x64xf32>
    %48 = vector.extract_strided_slice %41 {offsets = [0, 64], sizes = [8, 64], strides = [1, 1]} : vector<8x256xf32> to vector<8x64xf32>
    %49 = arith.negf %48 : vector<8x64xf32>
    %50 = math.exp %49 : vector<8x64xf32>
    %cst_22 = arith.constant 1.000000e+00 : f32
    %51 = vector.broadcast %cst_22 : f32 to vector<8x64xf32>
    %52 = arith.addf %51, %50 : vector<8x64xf32>
    %53 = arith.divf %51, %52 : vector<8x64xf32>
    %54 = vector.extract_strided_slice %41 {offsets = [0, 128], sizes = [8, 64], strides = [1, 1]} : vector<8x256xf32> to vector<8x64xf32>
    %55 = math.tanh %54 : vector<8x64xf32>
    %56 = vector.extract_strided_slice %41 {offsets = [0, 192], sizes = [8, 64], strides = [1, 1]} : vector<8x256xf32> to vector<8x64xf32>
    %57 = arith.negf %56 : vector<8x64xf32>
    %58 = math.exp %57 : vector<8x64xf32>
    %cst_23 = arith.constant 1.000000e+00 : f32
    %59 = vector.broadcast %cst_23 : f32 to vector<8x64xf32>
    %60 = arith.addf %59, %58 : vector<8x64xf32>
    %61 = arith.divf %59, %60 : vector<8x64xf32>
    %62 = arith.mulf %53, %35 : vector<8x64xf32>
    %63 = arith.mulf %47, %55 : vector<8x64xf32>
    %64 = arith.addf %62, %63 : vector<8x64xf32>
    %65 = math.tanh %64 : vector<8x64xf32>
    %66 = arith.mulf %61, %65 : vector<8x64xf32>
    %c8_24 = arith.constant 8 : index
    %c0_25 = arith.constant 0 : index
    %67 = vector.load %arg11[%c8_24, %c0_25] : memref<64x64xf32, #tpu.memory_space<vmem>>, vector<8x64xf32>
    tpu.vector_store %arg11[%c8_24, %c0_25], %66 {strides = array<i32>} : memref<64x64xf32, #tpu.memory_space<vmem>>, vector<8x64xf32>,
    %c16 = arith.constant 16 : index
    %c0_26 = arith.constant 0 : index
    %68 = vector.load %arg10[%c16, %c0_26] : memref<64x256xf32, #tpu.memory_space<vmem>>, vector<8x256xf32>
    %cst_27 = arith.constant dense<0.000000e+00> : vector<8x256xf32>
    %69 = tpu.matmul %66, %7, %cst_27 {dimension_numbers = #tpu.dot_dimension_numbers<[1], [0], [0], [1], [0, 0, 1, 1], [], []>} : vector<8x64xf32>, vector<64x256xf32>, vector<8x256xf32> -> vector<8x256xf32>
    %70 = arith.addf %68, %69 : vector<8x256xf32>
    %71 = vector.extract_strided_slice %70 {offsets = [0, 0], sizes = [8, 64], strides = [1, 1]} : vector<8x256xf32> to vector<8x64xf32>
    %72 = arith.negf %71 : vector<8x64xf32>
    %73 = math.exp %72 : vector<8x64xf32>
    %cst_28 = arith.constant 1.000000e+00 : f32
    %74 = vector.broadcast %cst_28 : f32 to vector<8x64xf32>
    %75 = arith.addf %74, %73 : vector<8x64xf32>
    %76 = arith.divf %74, %75 : vector<8x64xf32>
    %77 = vector.extract_strided_slice %70 {offsets = [0, 64], sizes = [8, 64], strides = [1, 1]} : vector<8x256xf32> to vector<8x64xf32>
    %78 = arith.negf %77 : vector<8x64xf32>
    %79 = math.exp %78 : vector<8x64xf32>
    %cst_29 = arith.constant 1.000000e+00 : f32
    %80 = vector.broadcast %cst_29 : f32 to vector<8x64xf32>
    %81 = arith.addf %80, %79 : vector<8x64xf32>
    %82 = arith.divf %80, %81 : vector<8x64xf32>
    %83 = vector.extract_strided_slice %70 {offsets = [0, 128], sizes = [8, 64], strides = [1, 1]} : vector<8x256xf32> to vector<8x64xf32>
    %84 = math.tanh %83 : vector<8x64xf32>
    %85 = vector.extract_strided_slice %70 {offsets = [0, 192], sizes = [8, 64], strides = [1, 1]} : vector<8x256xf32> to vector<8x64xf32>
    %86 = arith.negf %85 : vector<8x64xf32>
    %87 = math.exp %86 : vector<8x64xf32>
    %cst_30 = arith.constant 1.000000e+00 : f32
    %88 = vector.broadcast %cst_30 : f32 to vector<8x64xf32>
    %89 = arith.addf %88, %87 : vector<8x64xf32>
    %90 = arith.divf %88, %89 : vector<8x64xf32>
    %91 = arith.mulf %82, %64 : vector<8x64xf32>
    %92 = arith.mulf %76, %84 : vector<8x64xf32>
    %93 = arith.addf %91, %92 : vector<8x64xf32>
    %94 = math.tanh %93 : vector<8x64xf32>
    %95 = arith.mulf %90, %94 : vector<8x64xf32>
    %c16_31 = arith.constant 16 : index
    %c0_32 = arith.constant 0 : index
    %96 = vector.load %arg11[%c16_31, %c0_32] : memref<64x64xf32, #tpu.memory_space<vmem>>, vector<8x64xf32>
    tpu.vector_store %arg11[%c16_31, %c0_32], %95 {strides = array<i32>} : memref<64x64xf32, #tpu.memory_space<vmem>>, vector<8x64xf32>,
    %c24 = arith.constant 24 : index
    %c0_33 = arith.constant 0 : index
    %97 = vector.load %arg10[%c24, %c0_33] : memref<64x256xf32, #tpu.memory_space<vmem>>, vector<8x256xf32>
    %cst_34 = arith.constant dense<0.000000e+00> : vector<8x256xf32>
    %98 = tpu.matmul %95, %7, %cst_34 {dimension_numbers = #tpu.dot_dimension_numbers<[1], [0], [0], [1], [0, 0, 1, 1], [], []>} : vector<8x64xf32>, vector<64x256xf32>, vector<8x256xf32> -> vector<8x256xf32>
    %99 = arith.addf %97, %98 : vector<8x256xf32>
    %100 = vector.extract_strided_slice %99 {offsets = [0, 0], sizes = [8, 64], strides = [1, 1]} : vector<8x256xf32> to vector<8x64xf32>
    %101 = arith.negf %100 : vector<8x64xf32>
    %102 = math.exp %101 : vector<8x64xf32>
    %cst_35 = arith.constant 1.000000e+00 : f32
    %103 = vector.broadcast %cst_35 : f32 to vector<8x64xf32>
    %104 = arith.addf %103, %102 : vector<8x64xf32>
    %105 = arith.divf %103, %104 : vector<8x64xf32>
    %106 = vector.extract_strided_slice %99 {offsets = [0, 64], sizes = [8, 64], strides = [1, 1]} : vector<8x256xf32> to vector<8x64xf32>
    %107 = arith.negf %106 : vector<8x64xf32>
    %108 = math.exp %107 : vector<8x64xf32>
    %cst_36 = arith.constant 1.000000e+00 : f32
    %109 = vector.broadcast %cst_36 : f32 to vector<8x64xf32>
    %110 = arith.addf %109, %108 : vector<8x64xf32>
    %111 = arith.divf %109, %110 : vector<8x64xf32>
    %112 = vector.extract_strided_slice %99 {offsets = [0, 128], sizes = [8, 64], strides = [1, 1]} : vector<8x256xf32> to vector<8x64xf32>
    %113 = math.tanh %112 : vector<8x64xf32>
    %114 = vector.extract_strided_slice %99 {offsets = [0, 192], sizes = [8, 64], strides = [1, 1]} : vector<8x256xf32> to vector<8x64xf32>
    %115 = arith.negf %114 : vector<8x64xf32>
    %116 = math.exp %115 : vector<8x64xf32>
    %cst_37 = arith.constant 1.000000e+00 : f32
    %117 = vector.broadcast %cst_37 : f32 to vector<8x64xf32>
    %118 = arith.addf %117, %116 : vector<8x64xf32>
    %119 = arith.divf %117, %118 : vector<8x64xf32>
    %120 = arith.mulf %111, %93 : vector<8x64xf32>
    %121 = arith.mulf %105, %113 : vector<8x64xf32>
    %122 = arith.addf %120, %121 : vector<8x64xf32>
    %123 = math.tanh %122 : vector<8x64xf32>
    %124 = arith.mulf %119, %123 : vector<8x64xf32>
    %c24_38 = arith.constant 24 : index
    %c0_39 = arith.constant 0 : index
    %125 = vector.load %arg11[%c24_38, %c0_39] : memref<64x64xf32, #tpu.memory_space<vmem>>, vector<8x64xf32>
    tpu.vector_store %arg11[%c24_38, %c0_39], %124 {strides = array<i32>} : memref<64x64xf32, #tpu.memory_space<vmem>>, vector<8x64xf32>,
    %c32 = arith.constant 32 : index
    %c0_40 = arith.constant 0 : index
    %126 = vector.load %arg10[%c32, %c0_40] : memref<64x256xf32, #tpu.memory_space<vmem>>, vector<8x256xf32>
    %cst_41 = arith.constant dense<0.000000e+00> : vector<8x256xf32>
    %127 = tpu.matmul %124, %7, %cst_41 {dimension_numbers = #tpu.dot_dimension_numbers<[1], [0], [0], [1], [0, 0, 1, 1], [], []>} : vector<8x64xf32>, vector<64x256xf32>, vector<8x256xf32> -> vector<8x256xf32>
    %128 = arith.addf %126, %127 : vector<8x256xf32>
    %129 = vector.extract_strided_slice %128 {offsets = [0, 0], sizes = [8, 64], strides = [1, 1]} : vector<8x256xf32> to vector<8x64xf32>
    %130 = arith.negf %129 : vector<8x64xf32>
    %131 = math.exp %130 : vector<8x64xf32>
    %cst_42 = arith.constant 1.000000e+00 : f32
    %132 = vector.broadcast %cst_42 : f32 to vector<8x64xf32>
    %133 = arith.addf %132, %131 : vector<8x64xf32>
    %134 = arith.divf %132, %133 : vector<8x64xf32>
    %135 = vector.extract_strided_slice %128 {offsets = [0, 64], sizes = [8, 64], strides = [1, 1]} : vector<8x256xf32> to vector<8x64xf32>
    %136 = arith.negf %135 : vector<8x64xf32>
    %137 = math.exp %136 : vector<8x64xf32>
    %cst_43 = arith.constant 1.000000e+00 : f32
    %138 = vector.broadcast %cst_43 : f32 to vector<8x64xf32>
    %139 = arith.addf %138, %137 : vector<8x64xf32>
    %140 = arith.divf %138, %139 : vector<8x64xf32>
    %141 = vector.extract_strided_slice %128 {offsets = [0, 128], sizes = [8, 64], strides = [1, 1]} : vector<8x256xf32> to vector<8x64xf32>
    %142 = math.tanh %141 : vector<8x64xf32>
    %143 = vector.extract_strided_slice %128 {offsets = [0, 192], sizes = [8, 64], strides = [1, 1]} : vector<8x256xf32> to vector<8x64xf32>
    %144 = arith.negf %143 : vector<8x64xf32>
    %145 = math.exp %144 : vector<8x64xf32>
    %cst_44 = arith.constant 1.000000e+00 : f32
    %146 = vector.broadcast %cst_44 : f32 to vector<8x64xf32>
    %147 = arith.addf %146, %145 : vector<8x64xf32>
    %148 = arith.divf %146, %147 : vector<8x64xf32>
    %149 = arith.mulf %140, %122 : vector<8x64xf32>
    %150 = arith.mulf %134, %142 : vector<8x64xf32>
    %151 = arith.addf %149, %150 : vector<8x64xf32>
    %152 = math.tanh %151 : vector<8x64xf32>
    %153 = arith.mulf %148, %152 : vector<8x64xf32>
    %c32_45 = arith.constant 32 : index
    %c0_46 = arith.constant 0 : index
    %154 = vector.load %arg11[%c32_45, %c0_46] : memref<64x64xf32, #tpu.memory_space<vmem>>, vector<8x64xf32>
    tpu.vector_store %arg11[%c32_45, %c0_46], %153 {strides = array<i32>} : memref<64x64xf32, #tpu.memory_space<vmem>>, vector<8x64xf32>,
    %c40 = arith.constant 40 : index
    %c0_47 = arith.constant 0 : index
    %155 = vector.load %arg10[%c40, %c0_47] : memref<64x256xf32, #tpu.memory_space<vmem>>, vector<8x256xf32>
    %cst_48 = arith.constant dense<0.000000e+00> : vector<8x256xf32>
    %156 = tpu.matmul %153, %7, %cst_48 {dimension_numbers = #tpu.dot_dimension_numbers<[1], [0], [0], [1], [0, 0, 1, 1], [], []>} : vector<8x64xf32>, vector<64x256xf32>, vector<8x256xf32> -> vector<8x256xf32>
    %157 = arith.addf %155, %156 : vector<8x256xf32>
    %158 = vector.extract_strided_slice %157 {offsets = [0, 0], sizes = [8, 64], strides = [1, 1]} : vector<8x256xf32> to vector<8x64xf32>
    %159 = arith.negf %158 : vector<8x64xf32>
    %160 = math.exp %159 : vector<8x64xf32>
    %cst_49 = arith.constant 1.000000e+00 : f32
    %161 = vector.broadcast %cst_49 : f32 to vector<8x64xf32>
    %162 = arith.addf %161, %160 : vector<8x64xf32>
    %163 = arith.divf %161, %162 : vector<8x64xf32>
    %164 = vector.extract_strided_slice %157 {offsets = [0, 64], sizes = [8, 64], strides = [1, 1]} : vector<8x256xf32> to vector<8x64xf32>
    %165 = arith.negf %164 : vector<8x64xf32>
    %166 = math.exp %165 : vector<8x64xf32>
    %cst_50 = arith.constant 1.000000e+00 : f32
    %167 = vector.broadcast %cst_50 : f32 to vector<8x64xf32>
    %168 = arith.addf %167, %166 : vector<8x64xf32>
    %169 = arith.divf %167, %168 : vector<8x64xf32>
    %170 = vector.extract_strided_slice %157 {offsets = [0, 128], sizes = [8, 64], strides = [1, 1]} : vector<8x256xf32> to vector<8x64xf32>
    %171 = math.tanh %170 : vector<8x64xf32>
    %172 = vector.extract_strided_slice %157 {offsets = [0, 192], sizes = [8, 64], strides = [1, 1]} : vector<8x256xf32> to vector<8x64xf32>
    %173 = arith.negf %172 : vector<8x64xf32>
    %174 = math.exp %173 : vector<8x64xf32>
    %cst_51 = arith.constant 1.000000e+00 : f32
    %175 = vector.broadcast %cst_51 : f32 to vector<8x64xf32>
    %176 = arith.addf %175, %174 : vector<8x64xf32>
    %177 = arith.divf %175, %176 : vector<8x64xf32>
    %178 = arith.mulf %169, %151 : vector<8x64xf32>
    %179 = arith.mulf %163, %171 : vector<8x64xf32>
    %180 = arith.addf %178, %179 : vector<8x64xf32>
    %181 = math.tanh %180 : vector<8x64xf32>
    %182 = arith.mulf %177, %181 : vector<8x64xf32>
    %c40_52 = arith.constant 40 : index
    %c0_53 = arith.constant 0 : index
    %183 = vector.load %arg11[%c40_52, %c0_53] : memref<64x64xf32, #tpu.memory_space<vmem>>, vector<8x64xf32>
    tpu.vector_store %arg11[%c40_52, %c0_53], %182 {strides = array<i32>} : memref<64x64xf32, #tpu.memory_space<vmem>>, vector<8x64xf32>,
    %c48 = arith.constant 48 : index
    %c0_54 = arith.constant 0 : index
    %184 = vector.load %arg10[%c48, %c0_54] : memref<64x256xf32, #tpu.memory_space<vmem>>, vector<8x256xf32>
    %cst_55 = arith.constant dense<0.000000e+00> : vector<8x256xf32>
    %185 = tpu.matmul %182, %7, %cst_55 {dimension_numbers = #tpu.dot_dimension_numbers<[1], [0], [0], [1], [0, 0, 1, 1], [], []>} : vector<8x64xf32>, vector<64x256xf32>, vector<8x256xf32> -> vector<8x256xf32>
    %186 = arith.addf %184, %185 : vector<8x256xf32>
    %187 = vector.extract_strided_slice %186 {offsets = [0, 0], sizes = [8, 64], strides = [1, 1]} : vector<8x256xf32> to vector<8x64xf32>
    %188 = arith.negf %187 : vector<8x64xf32>
    %189 = math.exp %188 : vector<8x64xf32>
    %cst_56 = arith.constant 1.000000e+00 : f32
    %190 = vector.broadcast %cst_56 : f32 to vector<8x64xf32>
    %191 = arith.addf %190, %189 : vector<8x64xf32>
    %192 = arith.divf %190, %191 : vector<8x64xf32>
    %193 = vector.extract_strided_slice %186 {offsets = [0, 64], sizes = [8, 64], strides = [1, 1]} : vector<8x256xf32> to vector<8x64xf32>
    %194 = arith.negf %193 : vector<8x64xf32>
    %195 = math.exp %194 : vector<8x64xf32>
    %cst_57 = arith.constant 1.000000e+00 : f32
    %196 = vector.broadcast %cst_57 : f32 to vector<8x64xf32>
    %197 = arith.addf %196, %195 : vector<8x64xf32>
    %198 = arith.divf %196, %197 : vector<8x64xf32>
    %199 = vector.extract_strided_slice %186 {offsets = [0, 128], sizes = [8, 64], strides = [1, 1]} : vector<8x256xf32> to vector<8x64xf32>
    %200 = math.tanh %199 : vector<8x64xf32>
    %201 = vector.extract_strided_slice %186 {offsets = [0, 192], sizes = [8, 64], strides = [1, 1]} : vector<8x256xf32> to vector<8x64xf32>
    %202 = arith.negf %201 : vector<8x64xf32>
    %203 = math.exp %202 : vector<8x64xf32>
    %cst_58 = arith.constant 1.000000e+00 : f32
    %204 = vector.broadcast %cst_58 : f32 to vector<8x64xf32>
    %205 = arith.addf %204, %203 : vector<8x64xf32>
    %206 = arith.divf %204, %205 : vector<8x64xf32>
    %207 = arith.mulf %198, %180 : vector<8x64xf32>
    %208 = arith.mulf %192, %200 : vector<8x64xf32>
    %209 = arith.addf %207, %208 : vector<8x64xf32>
    %210 = math.tanh %209 : vector<8x64xf32>
    %211 = arith.mulf %206, %210 : vector<8x64xf32>
    %c48_59 = arith.constant 48 : index
    %c0_60 = arith.constant 0 : index
    %212 = vector.load %arg11[%c48_59, %c0_60] : memref<64x64xf32, #tpu.memory_space<vmem>>, vector<8x64xf32>
    tpu.vector_store %arg11[%c48_59, %c0_60], %211 {strides = array<i32>} : memref<64x64xf32, #tpu.memory_space<vmem>>, vector<8x64xf32>,
    %c56 = arith.constant 56 : index
    %c0_61 = arith.constant 0 : index
    %213 = vector.load %arg10[%c56, %c0_61] : memref<64x256xf32, #tpu.memory_space<vmem>>, vector<8x256xf32>
    %cst_62 = arith.constant dense<0.000000e+00> : vector<8x256xf32>
    %214 = tpu.matmul %211, %7, %cst_62 {dimension_numbers = #tpu.dot_dimension_numbers<[1], [0], [0], [1], [0, 0, 1, 1], [], []>} : vector<8x64xf32>, vector<64x256xf32>, vector<8x256xf32> -> vector<8x256xf32>
    %215 = arith.addf %213, %214 : vector<8x256xf32>
    %216 = vector.extract_strided_slice %215 {offsets = [0, 0], sizes = [8, 64], strides = [1, 1]} : vector<8x256xf32> to vector<8x64xf32>
    %217 = arith.negf %216 : vector<8x64xf32>
    %218 = math.exp %217 : vector<8x64xf32>
    %cst_63 = arith.constant 1.000000e+00 : f32
    %219 = vector.broadcast %cst_63 : f32 to vector<8x64xf32>
    %220 = arith.addf %219, %218 : vector<8x64xf32>
    %221 = arith.divf %219, %220 : vector<8x64xf32>
    %222 = vector.extract_strided_slice %215 {offsets = [0, 64], sizes = [8, 64], strides = [1, 1]} : vector<8x256xf32> to vector<8x64xf32>
    %223 = arith.negf %222 : vector<8x64xf32>
    %224 = math.exp %223 : vector<8x64xf32>
    %cst_64 = arith.constant 1.000000e+00 : f32
    %225 = vector.broadcast %cst_64 : f32 to vector<8x64xf32>
    %226 = arith.addf %225, %224 : vector<8x64xf32>
    %227 = arith.divf %225, %226 : vector<8x64xf32>
    %228 = vector.extract_strided_slice %215 {offsets = [0, 128], sizes = [8, 64], strides = [1, 1]} : vector<8x256xf32> to vector<8x64xf32>
    %229 = math.tanh %228 : vector<8x64xf32>
    %230 = vector.extract_strided_slice %215 {offsets = [0, 192], sizes = [8, 64], strides = [1, 1]} : vector<8x256xf32> to vector<8x64xf32>
    %231 = arith.negf %230 : vector<8x64xf32>
    %232 = math.exp %231 : vector<8x64xf32>
    %cst_65 = arith.constant 1.000000e+00 : f32
    %233 = vector.broadcast %cst_65 : f32 to vector<8x64xf32>
    %234 = arith.addf %233, %232 : vector<8x64xf32>
    %235 = arith.divf %233, %234 : vector<8x64xf32>
    %236 = arith.mulf %227, %209 : vector<8x64xf32>
    %237 = arith.mulf %221, %229 : vector<8x64xf32>
    %238 = arith.addf %236, %237 : vector<8x64xf32>
    %239 = math.tanh %238 : vector<8x64xf32>
    %240 = arith.mulf %235, %239 : vector<8x64xf32>
    %c56_66 = arith.constant 56 : index
    %c0_67 = arith.constant 0 : index
    %241 = vector.load %arg11[%c56_66, %c0_67] : memref<64x64xf32, #tpu.memory_space<vmem>>, vector<8x64xf32>
    tpu.vector_store %arg11[%c56_66, %c0_67], %240 {strides = array<i32>} : memref<64x64xf32, #tpu.memory_space<vmem>>, vector<8x64xf32>,
    %c0_68 = arith.constant 0 : index
    %c0_69 = arith.constant 0 : index
    %242 = vector.load %arg11[%c0_68, %c0_69] : memref<64x64xf32, #tpu.memory_space<vmem>>, vector<64x64xf32>
    %c0_70 = arith.constant 0 : index
    %c0_71 = arith.constant 0 : index
    %243 = vector.load %arg4[%c0_70, %c0_71] : memref<64x256xf32, #tpu.memory_space<vmem>>, vector<64x256xf32>
    %cst_72 = arith.constant dense<0.000000e+00> : vector<64x256xf32>
    %244 = tpu.matmul %242, %243, %cst_72 {dimension_numbers = #tpu.dot_dimension_numbers<[1], [0], [0], [1], [0, 0, 1, 1], [], []>} : vector<64x64xf32>, vector<64x256xf32>, vector<64x256xf32> -> vector<64x256xf32>
    %c0_73 = arith.constant 0 : index
    %c0_74 = arith.constant 0 : index
    %245 = vector.load %arg6[%c0_73, %c0_74] : memref<1x256xf32, #tpu.memory_space<vmem>>, vector<1x256xf32>
    %246 = vector.broadcast %245 : vector<1x256xf32> to vector<64x256xf32>
    %247 = arith.addf %244, %246 : vector<64x256xf32>
    %c0_75 = arith.constant 0 : index
    %c0_76 = arith.constant 0 : index
    %248 = vector.load %arg10[%c0_75, %c0_76] : memref<64x256xf32, #tpu.memory_space<vmem>>, vector<64x256xf32>
    tpu.vector_store %arg10[%c0_75, %c0_76], %247 {strides = array<i32>} : memref<64x256xf32, #tpu.memory_space<vmem>>, vector<64x256xf32>,
    %c0_77 = arith.constant 0 : index
    %c0_78 = arith.constant 0 : index
    %249 = vector.load %arg5[%c0_77, %c0_78] : memref<64x256xf32, #tpu.memory_space<vmem>>, vector<64x256xf32>
    %cst_79 = arith.constant 0.000000e+00 : f32
    %250 = vector.broadcast %cst_79 : f32 to vector<8x64xf32>
    %cst_80 = arith.constant 0.000000e+00 : f32
    %251 = vector.broadcast %cst_80 : f32 to vector<8x64xf32>
    %c0_81 = arith.constant 0 : index
    %c0_82 = arith.constant 0 : index
    %252 = vector.load %arg10[%c0_81, %c0_82] : memref<64x256xf32, #tpu.memory_space<vmem>>, vector<8x256xf32>
    %cst_83 = arith.constant dense<0.000000e+00> : vector<8x256xf32>
    %253 = tpu.matmul %250, %249, %cst_83 {dimension_numbers = #tpu.dot_dimension_numbers<[1], [0], [0], [1], [0, 0, 1, 1], [], []>} : vector<8x64xf32>, vector<64x256xf32>, vector<8x256xf32> -> vector<8x256xf32>
    %254 = arith.addf %252, %253 : vector<8x256xf32>
    %255 = vector.extract_strided_slice %254 {offsets = [0, 0], sizes = [8, 64], strides = [1, 1]} : vector<8x256xf32> to vector<8x64xf32>
    %256 = arith.negf %255 : vector<8x64xf32>
    %257 = math.exp %256 : vector<8x64xf32>
    %cst_84 = arith.constant 1.000000e+00 : f32
    %258 = vector.broadcast %cst_84 : f32 to vector<8x64xf32>
    %259 = arith.addf %258, %257 : vector<8x64xf32>
    %260 = arith.divf %258, %259 : vector<8x64xf32>
    %261 = vector.extract_strided_slice %254 {offsets = [0, 64], sizes = [8, 64], strides = [1, 1]} : vector<8x256xf32> to vector<8x64xf32>
    %262 = arith.negf %261 : vector<8x64xf32>
    %263 = math.exp %262 : vector<8x64xf32>
    %cst_85 = arith.constant 1.000000e+00 : f32
    %264 = vector.broadcast %cst_85 : f32 to vector<8x64xf32>
    %265 = arith.addf %264, %263 : vector<8x64xf32>
    %266 = arith.divf %264, %265 : vector<8x64xf32>
    %267 = vector.extract_strided_slice %254 {offsets = [0, 128], sizes = [8, 64], strides = [1, 1]} : vector<8x256xf32> to vector<8x64xf32>
    %268 = math.tanh %267 : vector<8x64xf32>
    %269 = vector.extract_strided_slice %254 {offsets = [0, 192], sizes = [8, 64], strides = [1, 1]} : vector<8x256xf32> to vector<8x64xf32>
    %270 = arith.negf %269 : vector<8x64xf32>
    %271 = math.exp %270 : vector<8x64xf32>
    %cst_86 = arith.constant 1.000000e+00 : f32
    %272 = vector.broadcast %cst_86 : f32 to vector<8x64xf32>
    %273 = arith.addf %272, %271 : vector<8x64xf32>
    %274 = arith.divf %272, %273 : vector<8x64xf32>
    %275 = arith.mulf %266, %251 : vector<8x64xf32>
    %276 = arith.mulf %260, %268 : vector<8x64xf32>
    %277 = arith.addf %275, %276 : vector<8x64xf32>
    %278 = math.tanh %277 : vector<8x64xf32>
    %279 = arith.mulf %274, %278 : vector<8x64xf32>
    %c8_87 = arith.constant 8 : index
    %c0_88 = arith.constant 0 : index
    %280 = vector.load %arg10[%c8_87, %c0_88] : memref<64x256xf32, #tpu.memory_space<vmem>>, vector<8x256xf32>
    %cst_89 = arith.constant dense<0.000000e+00> : vector<8x256xf32>
    %281 = tpu.matmul %279, %249, %cst_89 {dimension_numbers = #tpu.dot_dimension_numbers<[1], [0], [0], [1], [0, 0, 1, 1], [], []>} : vector<8x64xf32>, vector<64x256xf32>, vector<8x256xf32> -> vector<8x256xf32>
    %282 = arith.addf %280, %281 : vector<8x256xf32>
    %283 = vector.extract_strided_slice %282 {offsets = [0, 0], sizes = [8, 64], strides = [1, 1]} : vector<8x256xf32> to vector<8x64xf32>
    %284 = arith.negf %283 : vector<8x64xf32>
    %285 = math.exp %284 : vector<8x64xf32>
    %cst_90 = arith.constant 1.000000e+00 : f32
    %286 = vector.broadcast %cst_90 : f32 to vector<8x64xf32>
    %287 = arith.addf %286, %285 : vector<8x64xf32>
    %288 = arith.divf %286, %287 : vector<8x64xf32>
    %289 = vector.extract_strided_slice %282 {offsets = [0, 64], sizes = [8, 64], strides = [1, 1]} : vector<8x256xf32> to vector<8x64xf32>
    %290 = arith.negf %289 : vector<8x64xf32>
    %291 = math.exp %290 : vector<8x64xf32>
    %cst_91 = arith.constant 1.000000e+00 : f32
    %292 = vector.broadcast %cst_91 : f32 to vector<8x64xf32>
    %293 = arith.addf %292, %291 : vector<8x64xf32>
    %294 = arith.divf %292, %293 : vector<8x64xf32>
    %295 = vector.extract_strided_slice %282 {offsets = [0, 128], sizes = [8, 64], strides = [1, 1]} : vector<8x256xf32> to vector<8x64xf32>
    %296 = math.tanh %295 : vector<8x64xf32>
    %297 = vector.extract_strided_slice %282 {offsets = [0, 192], sizes = [8, 64], strides = [1, 1]} : vector<8x256xf32> to vector<8x64xf32>
    %298 = arith.negf %297 : vector<8x64xf32>
    %299 = math.exp %298 : vector<8x64xf32>
    %cst_92 = arith.constant 1.000000e+00 : f32
    %300 = vector.broadcast %cst_92 : f32 to vector<8x64xf32>
    %301 = arith.addf %300, %299 : vector<8x64xf32>
    %302 = arith.divf %300, %301 : vector<8x64xf32>
    %303 = arith.mulf %294, %277 : vector<8x64xf32>
    %304 = arith.mulf %288, %296 : vector<8x64xf32>
    %305 = arith.addf %303, %304 : vector<8x64xf32>
    %306 = math.tanh %305 : vector<8x64xf32>
    %307 = arith.mulf %302, %306 : vector<8x64xf32>
    %c16_93 = arith.constant 16 : index
    %c0_94 = arith.constant 0 : index
    %308 = vector.load %arg10[%c16_93, %c0_94] : memref<64x256xf32, #tpu.memory_space<vmem>>, vector<8x256xf32>
    %cst_95 = arith.constant dense<0.000000e+00> : vector<8x256xf32>
    %309 = tpu.matmul %307, %249, %cst_95 {dimension_numbers = #tpu.dot_dimension_numbers<[1], [0], [0], [1], [0, 0, 1, 1], [], []>} : vector<8x64xf32>, vector<64x256xf32>, vector<8x256xf32> -> vector<8x256xf32>
    %310 = arith.addf %308, %309 : vector<8x256xf32>
    %311 = vector.extract_strided_slice %310 {offsets = [0, 0], sizes = [8, 64], strides = [1, 1]} : vector<8x256xf32> to vector<8x64xf32>
    %312 = arith.negf %311 : vector<8x64xf32>
    %313 = math.exp %312 : vector<8x64xf32>
    %cst_96 = arith.constant 1.000000e+00 : f32
    %314 = vector.broadcast %cst_96 : f32 to vector<8x64xf32>
    %315 = arith.addf %314, %313 : vector<8x64xf32>
    %316 = arith.divf %314, %315 : vector<8x64xf32>
    %317 = vector.extract_strided_slice %310 {offsets = [0, 64], sizes = [8, 64], strides = [1, 1]} : vector<8x256xf32> to vector<8x64xf32>
    %318 = arith.negf %317 : vector<8x64xf32>
    %319 = math.exp %318 : vector<8x64xf32>
    %cst_97 = arith.constant 1.000000e+00 : f32
    %320 = vector.broadcast %cst_97 : f32 to vector<8x64xf32>
    %321 = arith.addf %320, %319 : vector<8x64xf32>
    %322 = arith.divf %320, %321 : vector<8x64xf32>
    %323 = vector.extract_strided_slice %310 {offsets = [0, 128], sizes = [8, 64], strides = [1, 1]} : vector<8x256xf32> to vector<8x64xf32>
    %324 = math.tanh %323 : vector<8x64xf32>
    %325 = vector.extract_strided_slice %310 {offsets = [0, 192], sizes = [8, 64], strides = [1, 1]} : vector<8x256xf32> to vector<8x64xf32>
    %326 = arith.negf %325 : vector<8x64xf32>
    %327 = math.exp %326 : vector<8x64xf32>
    %cst_98 = arith.constant 1.000000e+00 : f32
    %328 = vector.broadcast %cst_98 : f32 to vector<8x64xf32>
    %329 = arith.addf %328, %327 : vector<8x64xf32>
    %330 = arith.divf %328, %329 : vector<8x64xf32>
    %331 = arith.mulf %322, %305 : vector<8x64xf32>
    %332 = arith.mulf %316, %324 : vector<8x64xf32>
    %333 = arith.addf %331, %332 : vector<8x64xf32>
    %334 = math.tanh %333 : vector<8x64xf32>
    %335 = arith.mulf %330, %334 : vector<8x64xf32>
    %c24_99 = arith.constant 24 : index
    %c0_100 = arith.constant 0 : index
    %336 = vector.load %arg10[%c24_99, %c0_100] : memref<64x256xf32, #tpu.memory_space<vmem>>, vector<8x256xf32>
    %cst_101 = arith.constant dense<0.000000e+00> : vector<8x256xf32>
    %337 = tpu.matmul %335, %249, %cst_101 {dimension_numbers = #tpu.dot_dimension_numbers<[1], [0], [0], [1], [0, 0, 1, 1], [], []>} : vector<8x64xf32>, vector<64x256xf32>, vector<8x256xf32> -> vector<8x256xf32>
    %338 = arith.addf %336, %337 : vector<8x256xf32>
    %339 = vector.extract_strided_slice %338 {offsets = [0, 0], sizes = [8, 64], strides = [1, 1]} : vector<8x256xf32> to vector<8x64xf32>
    %340 = arith.negf %339 : vector<8x64xf32>
    %341 = math.exp %340 : vector<8x64xf32>
    %cst_102 = arith.constant 1.000000e+00 : f32
    %342 = vector.broadcast %cst_102 : f32 to vector<8x64xf32>
    %343 = arith.addf %342, %341 : vector<8x64xf32>
    %344 = arith.divf %342, %343 : vector<8x64xf32>
    %345 = vector.extract_strided_slice %338 {offsets = [0, 64], sizes = [8, 64], strides = [1, 1]} : vector<8x256xf32> to vector<8x64xf32>
    %346 = arith.negf %345 : vector<8x64xf32>
    %347 = math.exp %346 : vector<8x64xf32>
    %cst_103 = arith.constant 1.000000e+00 : f32
    %348 = vector.broadcast %cst_103 : f32 to vector<8x64xf32>
    %349 = arith.addf %348, %347 : vector<8x64xf32>
    %350 = arith.divf %348, %349 : vector<8x64xf32>
    %351 = vector.extract_strided_slice %338 {offsets = [0, 128], sizes = [8, 64], strides = [1, 1]} : vector<8x256xf32> to vector<8x64xf32>
    %352 = math.tanh %351 : vector<8x64xf32>
    %353 = vector.extract_strided_slice %338 {offsets = [0, 192], sizes = [8, 64], strides = [1, 1]} : vector<8x256xf32> to vector<8x64xf32>
    %354 = arith.negf %353 : vector<8x64xf32>
    %355 = math.exp %354 : vector<8x64xf32>
    %cst_104 = arith.constant 1.000000e+00 : f32
    %356 = vector.broadcast %cst_104 : f32 to vector<8x64xf32>
    %357 = arith.addf %356, %355 : vector<8x64xf32>
    %358 = arith.divf %356, %357 : vector<8x64xf32>
    %359 = arith.mulf %350, %333 : vector<8x64xf32>
    %360 = arith.mulf %344, %352 : vector<8x64xf32>
    %361 = arith.addf %359, %360 : vector<8x64xf32>
    %362 = math.tanh %361 : vector<8x64xf32>
    %363 = arith.mulf %358, %362 : vector<8x64xf32>
    %c32_105 = arith.constant 32 : index
    %c0_106 = arith.constant 0 : index
    %364 = vector.load %arg10[%c32_105, %c0_106] : memref<64x256xf32, #tpu.memory_space<vmem>>, vector<8x256xf32>
    %cst_107 = arith.constant dense<0.000000e+00> : vector<8x256xf32>
    %365 = tpu.matmul %363, %249, %cst_107 {dimension_numbers = #tpu.dot_dimension_numbers<[1], [0], [0], [1], [0, 0, 1, 1], [], []>} : vector<8x64xf32>, vector<64x256xf32>, vector<8x256xf32> -> vector<8x256xf32>
    %366 = arith.addf %364, %365 : vector<8x256xf32>
    %367 = vector.extract_strided_slice %366 {offsets = [0, 0], sizes = [8, 64], strides = [1, 1]} : vector<8x256xf32> to vector<8x64xf32>
    %368 = arith.negf %367 : vector<8x64xf32>
    %369 = math.exp %368 : vector<8x64xf32>
    %cst_108 = arith.constant 1.000000e+00 : f32
    %370 = vector.broadcast %cst_108 : f32 to vector<8x64xf32>
    %371 = arith.addf %370, %369 : vector<8x64xf32>
    %372 = arith.divf %370, %371 : vector<8x64xf32>
    %373 = vector.extract_strided_slice %366 {offsets = [0, 64], sizes = [8, 64], strides = [1, 1]} : vector<8x256xf32> to vector<8x64xf32>
    %374 = arith.negf %373 : vector<8x64xf32>
    %375 = math.exp %374 : vector<8x64xf32>
    %cst_109 = arith.constant 1.000000e+00 : f32
    %376 = vector.broadcast %cst_109 : f32 to vector<8x64xf32>
    %377 = arith.addf %376, %375 : vector<8x64xf32>
    %378 = arith.divf %376, %377 : vector<8x64xf32>
    %379 = vector.extract_strided_slice %366 {offsets = [0, 128], sizes = [8, 64], strides = [1, 1]} : vector<8x256xf32> to vector<8x64xf32>
    %380 = math.tanh %379 : vector<8x64xf32>
    %381 = vector.extract_strided_slice %366 {offsets = [0, 192], sizes = [8, 64], strides = [1, 1]} : vector<8x256xf32> to vector<8x64xf32>
    %382 = arith.negf %381 : vector<8x64xf32>
    %383 = math.exp %382 : vector<8x64xf32>
    %cst_110 = arith.constant 1.000000e+00 : f32
    %384 = vector.broadcast %cst_110 : f32 to vector<8x64xf32>
    %385 = arith.addf %384, %383 : vector<8x64xf32>
    %386 = arith.divf %384, %385 : vector<8x64xf32>
    %387 = arith.mulf %378, %361 : vector<8x64xf32>
    %388 = arith.mulf %372, %380 : vector<8x64xf32>
    %389 = arith.addf %387, %388 : vector<8x64xf32>
    %390 = math.tanh %389 : vector<8x64xf32>
    %391 = arith.mulf %386, %390 : vector<8x64xf32>
    %c40_111 = arith.constant 40 : index
    %c0_112 = arith.constant 0 : index
    %392 = vector.load %arg10[%c40_111, %c0_112] : memref<64x256xf32, #tpu.memory_space<vmem>>, vector<8x256xf32>
    %cst_113 = arith.constant dense<0.000000e+00> : vector<8x256xf32>
    %393 = tpu.matmul %391, %249, %cst_113 {dimension_numbers = #tpu.dot_dimension_numbers<[1], [0], [0], [1], [0, 0, 1, 1], [], []>} : vector<8x64xf32>, vector<64x256xf32>, vector<8x256xf32> -> vector<8x256xf32>
    %394 = arith.addf %392, %393 : vector<8x256xf32>
    %395 = vector.extract_strided_slice %394 {offsets = [0, 0], sizes = [8, 64], strides = [1, 1]} : vector<8x256xf32> to vector<8x64xf32>
    %396 = arith.negf %395 : vector<8x64xf32>
    %397 = math.exp %396 : vector<8x64xf32>
    %cst_114 = arith.constant 1.000000e+00 : f32
    %398 = vector.broadcast %cst_114 : f32 to vector<8x64xf32>
    %399 = arith.addf %398, %397 : vector<8x64xf32>
    %400 = arith.divf %398, %399 : vector<8x64xf32>
    %401 = vector.extract_strided_slice %394 {offsets = [0, 64], sizes = [8, 64], strides = [1, 1]} : vector<8x256xf32> to vector<8x64xf32>
    %402 = arith.negf %401 : vector<8x64xf32>
    %403 = math.exp %402 : vector<8x64xf32>
    %cst_115 = arith.constant 1.000000e+00 : f32
    %404 = vector.broadcast %cst_115 : f32 to vector<8x64xf32>
    %405 = arith.addf %404, %403 : vector<8x64xf32>
    %406 = arith.divf %404, %405 : vector<8x64xf32>
    %407 = vector.extract_strided_slice %394 {offsets = [0, 128], sizes = [8, 64], strides = [1, 1]} : vector<8x256xf32> to vector<8x64xf32>
    %408 = math.tanh %407 : vector<8x64xf32>
    %409 = vector.extract_strided_slice %394 {offsets = [0, 192], sizes = [8, 64], strides = [1, 1]} : vector<8x256xf32> to vector<8x64xf32>
    %410 = arith.negf %409 : vector<8x64xf32>
    %411 = math.exp %410 : vector<8x64xf32>
    %cst_116 = arith.constant 1.000000e+00 : f32
    %412 = vector.broadcast %cst_116 : f32 to vector<8x64xf32>
    %413 = arith.addf %412, %411 : vector<8x64xf32>
    %414 = arith.divf %412, %413 : vector<8x64xf32>
    %415 = arith.mulf %406, %389 : vector<8x64xf32>
    %416 = arith.mulf %400, %408 : vector<8x64xf32>
    %417 = arith.addf %415, %416 : vector<8x64xf32>
    %418 = math.tanh %417 : vector<8x64xf32>
    %419 = arith.mulf %414, %418 : vector<8x64xf32>
    %c48_117 = arith.constant 48 : index
    %c0_118 = arith.constant 0 : index
    %420 = vector.load %arg10[%c48_117, %c0_118] : memref<64x256xf32, #tpu.memory_space<vmem>>, vector<8x256xf32>
    %cst_119 = arith.constant dense<0.000000e+00> : vector<8x256xf32>
    %421 = tpu.matmul %419, %249, %cst_119 {dimension_numbers = #tpu.dot_dimension_numbers<[1], [0], [0], [1], [0, 0, 1, 1], [], []>} : vector<8x64xf32>, vector<64x256xf32>, vector<8x256xf32> -> vector<8x256xf32>
    %422 = arith.addf %420, %421 : vector<8x256xf32>
    %423 = vector.extract_strided_slice %422 {offsets = [0, 0], sizes = [8, 64], strides = [1, 1]} : vector<8x256xf32> to vector<8x64xf32>
    %424 = arith.negf %423 : vector<8x64xf32>
    %425 = math.exp %424 : vector<8x64xf32>
    %cst_120 = arith.constant 1.000000e+00 : f32
    %426 = vector.broadcast %cst_120 : f32 to vector<8x64xf32>
    %427 = arith.addf %426, %425 : vector<8x64xf32>
    %428 = arith.divf %426, %427 : vector<8x64xf32>
    %429 = vector.extract_strided_slice %422 {offsets = [0, 64], sizes = [8, 64], strides = [1, 1]} : vector<8x256xf32> to vector<8x64xf32>
    %430 = arith.negf %429 : vector<8x64xf32>
    %431 = math.exp %430 : vector<8x64xf32>
    %cst_121 = arith.constant 1.000000e+00 : f32
    %432 = vector.broadcast %cst_121 : f32 to vector<8x64xf32>
    %433 = arith.addf %432, %431 : vector<8x64xf32>
    %434 = arith.divf %432, %433 : vector<8x64xf32>
    %435 = vector.extract_strided_slice %422 {offsets = [0, 128], sizes = [8, 64], strides = [1, 1]} : vector<8x256xf32> to vector<8x64xf32>
    %436 = math.tanh %435 : vector<8x64xf32>
    %437 = vector.extract_strided_slice %422 {offsets = [0, 192], sizes = [8, 64], strides = [1, 1]} : vector<8x256xf32> to vector<8x64xf32>
    %438 = arith.negf %437 : vector<8x64xf32>
    %439 = math.exp %438 : vector<8x64xf32>
    %cst_122 = arith.constant 1.000000e+00 : f32
    %440 = vector.broadcast %cst_122 : f32 to vector<8x64xf32>
    %441 = arith.addf %440, %439 : vector<8x64xf32>
    %442 = arith.divf %440, %441 : vector<8x64xf32>
    %443 = arith.mulf %434, %417 : vector<8x64xf32>
    %444 = arith.mulf %428, %436 : vector<8x64xf32>
    %445 = arith.addf %443, %444 : vector<8x64xf32>
    %446 = math.tanh %445 : vector<8x64xf32>
    %447 = arith.mulf %442, %446 : vector<8x64xf32>
    %c56_123 = arith.constant 56 : index
    %c0_124 = arith.constant 0 : index
    %448 = vector.load %arg10[%c56_123, %c0_124] : memref<64x256xf32, #tpu.memory_space<vmem>>, vector<8x256xf32>
    %cst_125 = arith.constant dense<0.000000e+00> : vector<8x256xf32>
    %449 = tpu.matmul %447, %249, %cst_125 {dimension_numbers = #tpu.dot_dimension_numbers<[1], [0], [0], [1], [0, 0, 1, 1], [], []>} : vector<8x64xf32>, vector<64x256xf32>, vector<8x256xf32> -> vector<8x256xf32>
    %450 = arith.addf %448, %449 : vector<8x256xf32>
    %451 = vector.extract_strided_slice %450 {offsets = [0, 0], sizes = [8, 64], strides = [1, 1]} : vector<8x256xf32> to vector<8x64xf32>
    %452 = arith.negf %451 : vector<8x64xf32>
    %453 = math.exp %452 : vector<8x64xf32>
    %cst_126 = arith.constant 1.000000e+00 : f32
    %454 = vector.broadcast %cst_126 : f32 to vector<8x64xf32>
    %455 = arith.addf %454, %453 : vector<8x64xf32>
    %456 = arith.divf %454, %455 : vector<8x64xf32>
    %457 = vector.extract_strided_slice %450 {offsets = [0, 64], sizes = [8, 64], strides = [1, 1]} : vector<8x256xf32> to vector<8x64xf32>
    %458 = arith.negf %457 : vector<8x64xf32>
    %459 = math.exp %458 : vector<8x64xf32>
    %cst_127 = arith.constant 1.000000e+00 : f32
    %460 = vector.broadcast %cst_127 : f32 to vector<8x64xf32>
    %461 = arith.addf %460, %459 : vector<8x64xf32>
    %462 = arith.divf %460, %461 : vector<8x64xf32>
    %463 = vector.extract_strided_slice %450 {offsets = [0, 128], sizes = [8, 64], strides = [1, 1]} : vector<8x256xf32> to vector<8x64xf32>
    %464 = math.tanh %463 : vector<8x64xf32>
    %465 = vector.extract_strided_slice %450 {offsets = [0, 192], sizes = [8, 64], strides = [1, 1]} : vector<8x256xf32> to vector<8x64xf32>
    %466 = arith.negf %465 : vector<8x64xf32>
    %467 = math.exp %466 : vector<8x64xf32>
    %cst_128 = arith.constant 1.000000e+00 : f32
    %468 = vector.broadcast %cst_128 : f32 to vector<8x64xf32>
    %469 = arith.addf %468, %467 : vector<8x64xf32>
    %470 = arith.divf %468, %469 : vector<8x64xf32>
    %471 = arith.mulf %462, %445 : vector<8x64xf32>
    %472 = arith.mulf %456, %464 : vector<8x64xf32>
    %473 = arith.addf %471, %472 : vector<8x64xf32>
    %474 = math.tanh %473 : vector<8x64xf32>
    %475 = arith.mulf %470, %474 : vector<8x64xf32>
    %c0_129 = arith.constant 0 : index
    %c0_130 = arith.constant 0 : index
    %476 = vector.load %arg7[%c0_129, %c0_130] : memref<64x1xf32, #tpu.memory_space<vmem>>, vector<64x1xf32>
    %cst_131 = arith.constant dense<0.000000e+00> : vector<8x1xf32>
    %477 = tpu.matmul %475, %476, %cst_131 {dimension_numbers = #tpu.dot_dimension_numbers<[1], [0], [0], [1], [0, 0, 1, 1], [], []>} : vector<8x64xf32>, vector<64x1xf32>, vector<8x1xf32> -> vector<8x1xf32>
    %c0_132 = arith.constant 0 : index
    %c0_133 = arith.constant 0 : index
    %478 = vector.load %arg8[%c0_132, %c0_133] : memref<1x1xf32, #tpu.memory_space<vmem>>, vector<1x1xf32>
    %479 = vector.broadcast %478 : vector<1x1xf32> to vector<8x1xf32>
    %480 = arith.addf %477, %479 : vector<8x1xf32>
    %c0_134 = arith.constant 0 : index
    %c0_135 = arith.constant 0 : index
    %481 = vector.load %arg9[%c0_134, %c0_135] : memref<8x1xf32, #tpu.memory_space<vmem>>, vector<8x1xf32>
    tpu.vector_store %arg9[%c0_134, %c0_135], %480 {strides = array<i32>} : memref<8x1xf32, #tpu.memory_space<vmem>>, vector<8x1xf32>,
    return
  }
}

</mosaic_0001>

<bundles_post_ra>
// kernel: tpu_custom_call.1
= control target key start
LH: loop header
LB: loop body
LE: loop exit
PB: predicated region body
PF: predicated region fallthrough
CT: control target
= control target key end

     0   :  { %s3404_s0 = inlined_call_operand.vmem [shape: f32[64,8], index: 0, kind: input, shape index: {}]   ;;  %s3405_s1 = inlined_call_operand.vmem [shape: f32[8,256], index: 1, kind: input, shape index: {}]   ;;  %s3406_s2 = inlined_call_operand.vmem [shape: f32[64,256], index: 2, kind: input, shape index: {}]   ;;  %s3407_s3 = inlined_call_operand.vmem [shape: f32[1,256], index: 3, kind: input, shape index: {}]   ;;  %s3408_s4 = inlined_call_operand.hbm [shape: f32[64,256], index: 4, kind: input, shape index: {}]   ;;  %s3409_s5 = inlined_call_operand.hbm [shape: f32[64,256], index: 5, kind: input, shape index: {}]   ;;  %s3410_s6 = inlined_call_operand.vmem [shape: f32[1,256], index: 6, kind: input, shape index: {}]   ;;  %s3411_s7 = inlined_call_operand.vmem [shape: f32[64,1], index: 7, kind: input, shape index: {}]   ;;  %s3412_s8 = inlined_call_operand.<no memory space> [shape: f32[1,1], index: 8, kind: input, shape index: {}]   ;;  %s3413_s9 = inlined_call_operand.vmem [shape: f32[8,1], index: 9, kind: output, shape index: {}]  }
   0x1   :  { %v14_v0 = vstv %s3412_s8 }
   0x2   :  { %15 = vst [vmem:[#allocation4] sm:$0x1] %v14_v0 }
   0x3   :  { %16 = vsyncpa [#allocation6], 0 }
   0x4   :  { %17 = vsyncpa [#allocation8], 0  ;;  %s2890_s11 = smov [#allocation5]   ;;  %s2842_s15 = scalar_lea.hbm %s3408_s4, 2048 }
   0x5   :  { %s31_s12 = sshll.u32 %s2890_s11, 4  ;;  %p2843_p0 = scmp.ne.s32.totalorder %s3408_s4, %s2842_s15  ;;  %s32_s12 = int_to_ptr.vmem [resolvable:$true] %s31_s12 }
   0x6   :  { %p2846_p1 = scmp.lt.u32.totalorder %s2842_s15, %s3408_s4 }
   0x8   :  { %p2848_p2 = pnand %p2846_p1, %p2843_p0 }
   0xa   :  { %2851 = shalt.err (!%p2848_p2)
}
   0xb   :  { %s2852_s8 = scalar_lea.vmem %s32_s12, 2048  ;;  %p2857_p4 = scmp.lt.s32.totalorder %s32_s12, %s32_s12 }
   0xc   :  { %p2853_p3 = scmp.ne.s32.totalorder %s32_s12, %s2852_s8  ;;  %p2858_p5 = scmp.lt.s32.totalorder %s2852_s8, %s2852_s8 }
   0xe   :  { %p2859_p6 = por %p2858_p5, %p2857_p4 }
  0x10   :  { %p2860_p7 = pnand %p2859_p6, %p2853_p3 }
  0x12   :  { %2863 = shalt.err (!%p2860_p7)
}
  0x13   :  { %s2891_s20 = smov 256   ;;  %s2892_s21 = smov 16  }
  0x14   :  { %37 = dma.hbm_to_vmem [thread:$0]  %s3408_s4, 2048, %s32_s12, [#allocation6], %s2891_s20, %s2891_s20, %s2892_s21  }
  0x15   :  { %s2893_s24 = smov [#allocation7]   ;;  %s2864_s28 = scalar_lea.hbm %s3409_s5, 2048 }
  0x16   :  { %s43_s25 = sshll.u32 %s2893_s24, 4  ;;  %p2865_p8 = scmp.ne.s32.totalorder %s3409_s5, %s2864_s28  ;;  %s44_s25 = int_to_ptr.vmem [resolvable:$true] %s43_s25 }
  0x17   :  { %p2868_p9 = scmp.lt.u32.totalorder %s2864_s28, %s3409_s5 }
  0x19   :  { %p2870_p10 = pnand %p2868_p9, %p2865_p8 }
  0x1b   :  { %2873 = shalt.err (!%p2870_p10)
}
  0x1c   :  { %s2874_s13 = scalar_lea.vmem %s44_s25, 2048  ;;  %p2879_p12 = scmp.lt.s32.totalorder %s44_s25, %s44_s25 }
  0x1d   :  { %p2875_p11 = scmp.ne.s32.totalorder %s44_s25, %s2874_s13  ;;  %p2880_p13 = scmp.lt.s32.totalorder %s2874_s13, %s2874_s13 }
  0x1f   :  { %p2881_p0 = por %p2880_p13, %p2879_p12 }
  0x21   :  { %p2882_p1 = pnand %p2881_p0, %p2875_p11 }
  0x23   :  { %2885 = shalt.err (!%p2882_p1)
}
  0x24   :  { %49 = dma.hbm_to_vmem [thread:$0]  %s3409_s5, 2048, %s44_s25, [#allocation8], %s2891_s20, %s2891_s20, %s2892_s21  }
  0x25   :  { %2886 = dma.done.wait [#allocation6], 2048  }
  0x26   :  { %2887 = vsyncadd [#allocation6], 4294965248 }
  0x27   :  { %2888 = dma.done.wait [#allocation8], 2048  }
  0x28   :  { %2889 = vsyncadd [#allocation8], 4294965248  ;;  %v2894_v1 = vmov 0.0   ;;  %v71_v2 = vld [vmem:[%s3405_s1 + $0x8] sm:$0xff]  ;;  %v70_v3 = vld [vmem:[%s3405_s1] sm:$0xff]  ;;  %vm84_vm0 = vcmask 64512   ;;  %v74_v36 = vlaneseq }
  0x29   :  { %173 = vmatprep.mubr.f32.mxu0 %v2894_v1  ;;  %1212 = vmatprep.mubr.f32.mxu1 %v2894_v1  ;;  %v62_v4 = vld [vmem:[%s3404_s0] sm:$0xff]  ;;  %v239_v5 = vld [vmem:[%s3406_s2 + $0x8] sm:$0xff]  ;;  %v241_v6 = vld [vmem:[%s3406_s2 + $0x18] sm:$0xff]  ;;  %vm256_vm1 = vcmask 523264   ;;  %vm2897_vm2 = vmmov 0   ;;  %vm2194_vm3 = vcmask 7168  }
  0x2a   :  { %109 = vmatprep.subr.mxu0 %v71_v2  ;;  %v238_v7 = vld [vmem:[%s3406_s2] sm:$0xff]  ;;  %v2995_v8 = vpack.c.bf16 %v241_v6, %v239_v5  ;;  %v240_v9 = vld [vmem:[%s3406_s2 + $0x10] sm:$0xff]  ;;  %v243_v11 = vld [vmem:[%s3406_s2 + $0x28] sm:$0xff]  ;;  %v3106_v37 = vshrl.u32 %v74_v36, 7 }
  0x2b   :  { %110 = vmatpush1.msra.mxu0 %v70_v3  ;;  %v3001_v10 = vpack.c.bf16 %v240_v9, %v238_v7  ;;  %v245_v12 = vld [vmem:[%s3406_s2 + $0x38] sm:$0xff]  ;;  %v242_v13 = vld [vmem:[%s3406_s2 + $0x20] sm:$0xff]  ;;  %v63_v14 = vld [vmem:[%s3404_s0 + $0x8] sm:$0xff] }
  0x2c   :  { %2202 = vmatmul.mubr.msk.f32.vlgmr.msra.gmra.mrb[0].mxu0 %vm84_vm0, %v62_v4  ;;  %2295 = vmatprep.subr.bf16.mxu0 %v2995_v8  ;;  %v3017_v15 = vpack.c.bf16 %v245_v12, %v243_v11  ;;  %v244_v16 = vld [vmem:[%s3406_s2 + $0x30] sm:$0xff]  ;;  %v247_v18 = vld [vmem:[%s3406_s2 + $0x48] sm:$0xff]  ;;  %v249_v19 = vld [vmem:[%s3406_s2 + $0x58] sm:$0xff]  ;;  %v76_v38 = vsub.s32 0, %v3106_v37  ;;  %v80_v45 = vsub.s32 1, %v3106_v37 }
  0x2d   :  { %179 = vmatprep.mubr.f32.mxu0 %v2894_v1  ;;  %2297 = vmatpush1.bf16.msra.mxu0 %v3001_v10  ;;  %v3023_v17 = vpack.c.bf16 %v244_v16, %v242_v13  ;;  %v3032_v20 = vpack.c.bf16 %v249_v19, %v247_v18  ;;  %v246_v21 = vld [vmem:[%s3406_s2 + $0x40] sm:$0xff]  ;;  %v248_v22 = vld [vmem:[%s3406_s2 + $0x50] sm:$0xff]  ;;  %v251_v23 = vld [vmem:[%s3406_s2 + $0x68] sm:$0xff] }
  0x2e   :  { %2299 = vmatprep.subr.bf16.mxu0 %v3017_v15  ;;  %v253_v24 = vld [vmem:[%s3406_s2 + $0x78] sm:$0xff]  ;;  %v64_v25 = vld [vmem:[%s3404_s0 + $0x10] sm:$0xff]  ;;  %v3052_v26 = vpack.c.bf16 %v248_v22, %v246_v21  ;;  %v250_v28 = vld [vmem:[%s3406_s2 + $0x60] sm:$0xff] }
  0x2f   :  { %v3055_v27 = vpack.c.bf16 %v253_v24, %v251_v23  ;;  %v252_v29 = vld [vmem:[%s3406_s2 + $0x70] sm:$0xff]  ;;  %v65_v30 = vld [vmem:[%s3404_s0 + $0x18] sm:$0xff]  ;;  %v66_v32 = vld [vmem:[%s3404_s0 + $0x20] sm:$0xff] }
  0x30   :  { %2203 = vmatmul.mubr.msk.f32.gmra.mrb[2].mxu0 %vm84_vm0, %v63_v14  ;;  %v3069_v31 = vpack.c.bf16 %v252_v29, %v250_v28  ;;  %v67_v33 = vld [vmem:[%s3404_s0 + $0x28] sm:$0xff]  ;;  %v68_v34 = vld [vmem:[%s3404_s0 + $0x30] sm:$0xff]  ;;  %v69_v35 = vld [vmem:[%s3404_s0 + $0x38] sm:$0xff] }
  0x31   :  { %185 = vmatprep.mubr.f32.mxu0 %v2894_v1  ;;  %2301 = vmatpush1.bf16.msra.mxu0 %v3023_v17  ;;  %v72_v39 = vld [vmem:[%s3407_s3] sm:$0x3]  ;;  %s2895_s3 = smov 64   ;;  %v1097_v53 = vld [vmem:[#allocation5 + $0x8] sm:$0xff]  ;;  %v1098_v57 = vld [vmem:[#allocation5 + $0x10] sm:$0xff] }
  0x32   :  { %2303 = vmatprep.subr.bf16.mxu0 %v3032_v20  ;;  %v3114_v40 = vrot.slane %v72_v39, %v76_v38  ;;  %v3120_v46 = vrot.slane %v72_v39, %v80_v45  ;;  %v1099_v54 = vld [vmem:[#allocation5 + $0x18] sm:$0xff]  ;;  %v1096_v55 = vld [vmem:[#allocation5] sm:$0xff]  ;;  %v1101_v58 = vld [vmem:[#allocation5 + $0x28] sm:$0xff] }
  0x33   :  { %v2422_v56 = vpack.c.bf16 %v1099_v54, %v1097_v53  ;;  %v1103_v59 = vld [vmem:[#allocation5 + $0x38] sm:$0xff]  ;;  %v2424_v60 = vpack.c.bf16 %v1098_v57, %v1096_v55  ;;  %v1100_v62 = vld [vmem:[#allocation5 + $0x20] sm:$0xff]  ;;  %v1102_v63 = vld [vmem:[#allocation5 + $0x30] sm:$0xff] }
  0x34   :  { %2204 = vmatmul.mubr.msk.f32.gmra.mrb[4].mxu0 %vm84_vm0, %v64_v25  ;;  %v2426_v61 = vpack.c.bf16 %v1103_v59, %v1101_v58  ;;  %v2428_v0 = vpack.c.bf16 %v1102_v63, %v1100_v62  ;;  %v1105_v7 = vld [vmem:[#allocation5 + $0x48] sm:$0xff]  ;;  %v1107_v9 = vld [vmem:[#allocation5 + $0x58] sm:$0xff]  ;;  %v1104_v13 = vld [vmem:[#allocation5 + $0x40] sm:$0xff] }
  0x35   :  { %191 = vmatprep.mubr.f32.mxu0 %v2894_v1  ;;  %2305 = vmatpush1.bf16.msra.mxu0 %v3052_v26  ;;  %v2430_v12 = vpack.c.bf16 %v1107_v9, %v1105_v7  ;;  %v1106_v14 = vld [vmem:[#allocation5 + $0x50] sm:$0xff]  ;;  %v1109_v18 = vld [vmem:[#allocation5 + $0x68] sm:$0xff]  ;;  %v1111_v19 = vld [vmem:[#allocation5 + $0x78] sm:$0xff] }
  0x36   :  { %2307 = vmatprep.subr.bf16.mxu0 %v3055_v27  ;;  %2423 = vmatprep.subr.bf16.mxu1 %v2422_v56  ;;  %v2432_v16 = vpack.c.bf16 %v1106_v14, %v1104_v13  ;;  %v1108_v21 = vld [vmem:[#allocation5 + $0x60] sm:$0xff]  ;;  %v2434_v22 = vpack.c.bf16 %v1111_v19, %v1109_v18  ;;  %v1110_v23 = vld [vmem:[#allocation5 + $0x70] sm:$0xff] }
  0x37   :  { %2425 = vmatpush1.bf16.msra.mxu1 %v2424_v60  ;;  %v2436_v24 = vpack.c.bf16 %v1110_v23, %v1108_v21 }
  0x38   :  { %2205 = vmatmul.mubr.msk.f32.gmra.mrb[6].mxu0 %vm84_vm0, %v65_v30  ;;  %2427 = vmatprep.subr.bf16.mxu1 %v2426_v61 }
  0x39   :  { %197 = vmatprep.mubr.f32.mxu0 %v2894_v1  ;;  %2309 = vmatpush1.bf16.msra.mxu0 %v3069_v31 }
  0x3a   :  { %2311 = vmatprep.subr.bf16.mxu0 %v2995_v8 }
  0x3b   :  { %2429 = vmatpush1.bf16.msra.mxu1 %v2428_v0 }
  0x3c   :  { %2206 = vmatmul.mubr.msk.f32.gmra.mrb[8].mxu0 %vm84_vm0, %v66_v32  ;;  %2431 = vmatprep.subr.bf16.mxu1 %v2430_v12 }
  0x3d   :  { %203 = vmatprep.mubr.f32.mxu0 %v2894_v1 }
  0x3f   :  { %2433 = vmatpush1.bf16.msra.mxu1 %v2432_v16 }
  0x40   :  { %2207 = vmatmul.mubr.msk.f32.gmra.mrb[10].mxu0 %vm84_vm0, %v67_v33  ;;  %2435 = vmatprep.subr.bf16.mxu1 %v2434_v22 }
  0x41   :  { %209 = vmatprep.mubr.f32.mxu0 %v2894_v1 }
  0x43   :  { %2437 = vmatpush1.bf16.msra.mxu1 %v2436_v24 }
  0x44   :  { %2208 = vmatmul.mubr.msk.f32.gmra.mrb[12].mxu0 %vm84_vm0, %v68_v34 }
  0x45   :  { %215 = vmatprep.mubr.f32.mxu0 %v2894_v1 }
  0x48   :  { %2209 = vmatmul.mubr.msk.f32.gmra.mrb[14].mxu0 %vm84_vm0, %v69_v35 }
  0x49   :  { %324 = vmatprep.mubr.f32.mxu0 %v2894_v1 }
  0x4c   :  { %325 = vmatmul.mubr.f32.vlgmr.msra.gmra.mrb[0].mxu0 %v2894_v1 }
  0x4d   :  { %2313 = vmatpush1.bf16.msra.mxu0 %v3001_v10  ;;  %428 = vmatprep.mubr.f32.mxu0 %v2894_v1 }
  0x4e   :  { %2315 = vmatprep.subr.bf16.mxu0 %v3017_v15 }
  0x51   :  { %2317 = vmatpush1.bf16.msra.mxu0 %v3023_v17 }
  0x52   :  { %2319 = vmatprep.subr.bf16.mxu0 %v3032_v20 }
  0x55   :  { %2321 = vmatpush1.bf16.msra.mxu0 %v3052_v26 }
  0x56   :  { %2323 = vmatprep.subr.bf16.mxu0 %v3055_v27 }
  0x59   :  { %2325 = vmatpush1.bf16.msra.mxu0 %v3069_v31 }
  0x5a   :  { %2327 = vmatprep.subr.bf16.mxu0 %v2995_v8 }
 0x11f   :  { %v326_v41 = vpop.f32.mrb[0].mxu0 }
 0x120   :  { %v2578_v42 = vadd.f32 %v326_v41, %v3114_v40  ;;  %v328_v43 = vpop.f32.mrb[1].mxu0 }
 0x121   :  { %v2579_v47 = vadd.f32 %v328_v43, %v3120_v46 }
 0x122   :  { %v2210_v44 = vmul.f32 -1.442695, %v2578_v42 }
 0x123   :  { %v2211_v2 = vmul.f32 -1.442695, %v2579_v47 }
 0x124   :  { %2650 = vpow2.f32 %v2210_v44 }
 0x125   :  { %2652 = vtanh.f32 %v2579_v47 }
 0x12e   :  { %v2651_v48 = vpop.eup %2650 }
 0x12f   :  { %v336_v49 = vadd.f32 1.0, %v2651_v48  ;;  %v2653_v50 = vpop.eup %2652 }
 0x131   :  { %2654 = vrcp.f32 %v336_v49 }
 0x132   :  { %2656 = vpow2.f32 %v2211_v2 }
 0x13b   :  { %v2655_v51 = vpop.eup %2654 }
 0x13c   :  { %v347_v52 = vmul.f32 %v2655_v51, %v2653_v50  ;;  %v2657_v3 = vpop.eup %2656  ;;  %v346_v5 = vmul.f32 0.0, %v2655_v51 }
 0x13d   :  { %v343_v4 = vadd.f32 1.0, %v2657_v3 }
 0x13e   :  { %349 = vrot.lane.b32.xlu0 %v347_v52, %s2895_s3 }
 0x13f   :  { %2658 = vrcp.f32 %v343_v4 }
 0x149   :  { %v2659_v25 = vpop.eup %2658 }
 0x1b0   :  { %v350_v6 = vpop.permute.xlu0 %349 }
 0x1b1   :  { %v352_v11 = vadd.f32 %v350_v6, %v346_v5 }
 0x1b3   :  { %2660 = vtanh.f32 %v352_v11 }
 0x1bd   :  { %v2661_v28 = vpop.eup %2660 }
 0x1be   :  { %v354_v29 = vmul.f32 %v2661_v28, %v2659_v25 }
 0x1c0   :  { %356 = vrot.lane.b32.xlu0 %v354_v29, %s2895_s3 }
 0x232   :  { %v357_v30 = vpop.permute.xlu0 %356 }
 0x233   :  { %359 = vst.msk [vmem:[#allocation3] sm:$0xff] %vm256_vm1, %v357_v30  ;;  %2212 = vmatmul.mubr.msk.f32.vlgmr.msra.gmra.mrb[2].mxu0 %vm256_vm1, %v357_v30 }
 0x234   :  { %2329 = vmatpush1.bf16.msra.mxu0 %v3001_v10  ;;  %532 = vmatprep.mubr.f32.mxu0 %v2894_v1 }
 0x235   :  { %2331 = vmatprep.subr.bf16.mxu0 %v3017_v15 }
 0x238   :  { %2333 = vmatpush1.bf16.msra.mxu0 %v3023_v17 }
 0x239   :  { %2335 = vmatprep.subr.bf16.mxu0 %v3032_v20 }
 0x23a   :  { %v1088_v32 = vld [vmem:[#allocation3] sm:$0xff] }
 0x23b   :  { %2233 = vmatmul.mubr.msk.f32.vlgmr.msra.gmra.mrb[0].mxu1 %vm256_vm1, %v1088_v32 }
 0x23c   :  { %2337 = vmatpush1.bf16.msra.mxu0 %v3052_v26  ;;  %1218 = vmatprep.mubr.f32.mxu1 %v2894_v1 }
 0x23d   :  { %2339 = vmatprep.subr.bf16.mxu0 %v3055_v27 }
 0x240   :  { %2341 = vmatpush1.bf16.msra.mxu0 %v3069_v31 }
 0x241   :  { %2343 = vmatprep.subr.bf16.mxu0 %v2995_v8 }
 0x306   :  { %v430_v33 = vpop.f32.mrb[2].mxu0 }
 0x307   :  { %v2580_v34 = vadd.f32 %v430_v33, %v3114_v40  ;;  %v432_v35 = vpop.f32.mrb[3].mxu0 }
 0x308   :  { %v2581_v39 = vadd.f32 %v432_v35, %v3120_v46 }
 0x309   :  { %v2213_v36 = vmul.f32 -1.442695, %v2580_v34 }
 0x30a   :  { %v2214_v48 = vmul.f32 -1.442695, %v2581_v39 }
 0x30b   :  { %2662 = vpow2.f32 %v2213_v36 }
 0x30c   :  { %2664 = vtanh.f32 %v2581_v39 }
 0x315   :  { %v2663_v41 = vpop.eup %2662 }
 0x316   :  { %v440_v42 = vadd.f32 1.0, %v2663_v41  ;;  %v2665_v43 = vpop.eup %2664 }
 0x318   :  { %2666 = vrcp.f32 %v440_v42 }
 0x319   :  { %2668 = vpow2.f32 %v2214_v48 }
 0x322   :  { %v2667_v44 = vpop.eup %2666 }
 0x323   :  { %v451_v47 = vmul.f32 %v2667_v44, %v2665_v43  ;;  %v2669_v49 = vpop.eup %2668  ;;  %v450_v51 = vmul.f32 %v2667_v44, %v352_v11 }
 0x324   :  { %v447_v50 = vadd.f32 1.0, %v2669_v49 }
 0x325   :  { %453 = vrot.lane.b32.xlu1 %v451_v47, %s2895_s3 }
 0x326   :  { %2670 = vrcp.f32 %v447_v50 }
 0x330   :  { %v2671_v54 = vpop.eup %2670 }
 0x397   :  { %v454_v52 = vpop.permute.xlu1 %453 }
 0x398   :  { %v456_v53 = vadd.f32 %v454_v52, %v450_v51 }
 0x39a   :  { %2672 = vtanh.f32 %v456_v53 }
 0x3a4   :  { %v2673_v55 = vpop.eup %2672 }
 0x3a5   :  { %v458_v56 = vmul.f32 %v2673_v55, %v2671_v54 }
 0x3a7   :  { %460 = vrot.lane.b32.xlu1 %v458_v56, %s2895_s3 }
 0x419   :  { %v461_v57 = vpop.permute.xlu1 %460 }
 0x41a   :  { %463 = vst.msk [vmem:[#allocation3 + $0x8] sm:$0xff] %vm256_vm1, %v461_v57  ;;  %2215 = vmatmul.mubr.msk.f32.vlgmr.msra.gmra.mrb[4].mxu0 %vm256_vm1, %v461_v57 }
 0x41b   :  { %2345 = vmatpush1.bf16.msra.mxu0 %v3001_v10  ;;  %636 = vmatprep.mubr.f32.mxu0 %v2894_v1 }
 0x41c   :  { %2347 = vmatprep.subr.bf16.mxu0 %v3017_v15 }
 0x41f   :  { %2349 = vmatpush1.bf16.msra.mxu0 %v3023_v17 }
 0x420   :  { %2351 = vmatprep.subr.bf16.mxu0 %v3032_v20 }
 0x421   :  { %v1089_v58 = vld [vmem:[#allocation3 + $0x8] sm:$0xff] }
 0x422   :  { %2234 = vmatmul.mubr.msk.f32.gmra.mrb[2].mxu1 %vm256_vm1, %v1089_v58 }
 0x423   :  { %2353 = vmatpush1.bf16.msra.mxu0 %v3052_v26  ;;  %1224 = vmatprep.mubr.f32.mxu1 %v2894_v1 }
 0x424   :  { %2355 = vmatprep.subr.bf16.mxu0 %v3055_v27 }
 0x427   :  { %2357 = vmatpush1.bf16.msra.mxu0 %v3069_v31 }
 0x428   :  { %2359 = vmatprep.subr.bf16.mxu0 %v2995_v8 }
 0x4ed   :  { %v534_v59 = vpop.f32.mrb[4].mxu0 }
 0x4ee   :  { %v2582_v60 = vadd.f32 %v534_v59, %v3114_v40  ;;  %v536_v61 = vpop.f32.mrb[5].mxu0 }
 0x4ef   :  { %v2583_v63 = vadd.f32 %v536_v61, %v3120_v46 }
 0x4f0   :  { %v2216_v62 = vmul.f32 -1.442695, %v2582_v60 }
 0x4f1   :  { %v2217_v6 = vmul.f32 -1.442695, %v2583_v63 }
 0x4f2   :  { %2674 = vpow2.f32 %v2216_v62 }
 0x4f3   :  { %2676 = vtanh.f32 %v2583_v63 }
 0x4fc   :  { %v2675_v0 = vpop.eup %2674 }
 0x4fd   :  { %v544_v2 = vadd.f32 1.0, %v2675_v0  ;;  %v2677_v3 = vpop.eup %2676 }
 0x4ff   :  { %2678 = vrcp.f32 %v544_v2 }
 0x500   :  { %2680 = vpow2.f32 %v2217_v6 }
 0x509   :  { %v2679_v4 = vpop.eup %2678 }
 0x50a   :  { %v555_v5 = vmul.f32 %v2679_v4, %v2677_v3  ;;  %v2681_v7 = vpop.eup %2680  ;;  %v554_v11 = vmul.f32 %v2679_v4, %v456_v53 }
 0x50b   :  { %v551_v9 = vadd.f32 1.0, %v2681_v7 }
 0x50c   :  { %557 = vrot.lane.b32.xlu0 %v555_v5, %s2895_s3 }
 0x50d   :  { %2682 = vrcp.f32 %v551_v9 }
 0x517   :  { %v2683_v14 = vpop.eup %2682 }
 0x57e   :  { %v558_v12 = vpop.permute.xlu0 %557 }
 0x57f   :  { %v560_v13 = vadd.f32 %v558_v12, %v554_v11 }
 0x581   :  { %2684 = vtanh.f32 %v560_v13 }
 0x58b   :  { %v2685_v16 = vpop.eup %2684 }
 0x58c   :  { %v562_v18 = vmul.f32 %v2685_v16, %v2683_v14 }
 0x58e   :  { %564 = vrot.lane.b32.xlu1 %v562_v18, %s2895_s3 }
 0x600   :  { %v565_v19 = vpop.permute.xlu1 %564 }
 0x601   :  { %567 = vst.msk [vmem:[#allocation3 + $0x10] sm:$0xff] %vm256_vm1, %v565_v19  ;;  %2218 = vmatmul.mubr.msk.f32.vlgmr.msra.gmra.mrb[6].mxu0 %vm256_vm1, %v565_v19 }
 0x602   :  { %2361 = vmatpush1.bf16.msra.mxu0 %v3001_v10  ;;  %740 = vmatprep.mubr.f32.mxu0 %v2894_v1 }
 0x603   :  { %2363 = vmatprep.subr.bf16.mxu0 %v3017_v15 }
 0x606   :  { %2365 = vmatpush1.bf16.msra.mxu0 %v3023_v17 }
 0x607   :  { %2367 = vmatprep.subr.bf16.mxu0 %v3032_v20 }
 0x608   :  { %v1090_v21 = vld [vmem:[#allocation3 + $0x10] sm:$0xff] }
 0x609   :  { %2235 = vmatmul.mubr.msk.f32.gmra.mrb[4].mxu1 %vm256_vm1, %v1090_v21 }
 0x60a   :  { %2369 = vmatpush1.bf16.msra.mxu0 %v3052_v26  ;;  %1230 = vmatprep.mubr.f32.mxu1 %v2894_v1 }
 0x60b   :  { %2371 = vmatprep.subr.bf16.mxu0 %v3055_v27 }
 0x60e   :  { %2373 = vmatpush1.bf16.msra.mxu0 %v3069_v31 }
 0x60f   :  { %2375 = vmatprep.subr.bf16.mxu0 %v2995_v8 }
 0x6d4   :  { %v638_v22 = vpop.f32.mrb[6].mxu0 }
 0x6d5   :  { %v2584_v23 = vadd.f32 %v638_v22, %v3114_v40  ;;  %v640_v24 = vpop.f32.mrb[7].mxu0 }
 0x6d6   :  { %v2585_v28 = vadd.f32 %v640_v24, %v3120_v46 }
 0x6d7   :  { %v2219_v25 = vmul.f32 -1.442695, %v2584_v23 }
 0x6d8   :  { %v2220_v35 = vmul.f32 -1.442695, %v2585_v28 }
 0x6d9   :  { %2686 = vpow2.f32 %v2219_v25 }
 0x6da   :  { %2688 = vtanh.f32 %v2585_v28 }
 0x6e3   :  { %v2687_v29 = vpop.eup %2686 }
 0x6e4   :  { %v648_v30 = vadd.f32 1.0, %v2687_v29  ;;  %v2689_v32 = vpop.eup %2688 }
 0x6e6   :  { %2690 = vrcp.f32 %v648_v30 }
 0x6e7   :  { %2692 = vpow2.f32 %v2220_v35 }
 0x6f0   :  { %v2691_v33 = vpop.eup %2690 }
 0x6f1   :  { %v659_v34 = vmul.f32 %v2691_v33, %v2689_v32  ;;  %v2693_v36 = vpop.eup %2692  ;;  %v658_v41 = vmul.f32 %v2691_v33, %v560_v13 }
 0x6f2   :  { %v655_v39 = vadd.f32 1.0, %v2693_v36 }
 0x6f3   :  { %661 = vrot.lane.b32.xlu0 %v659_v34, %s2895_s3 }
 0x6f4   :  { %2694 = vrcp.f32 %v655_v39 }
 0x6fe   :  { %v2695_v44 = vpop.eup %2694 }
 0x765   :  { %v662_v42 = vpop.permute.xlu0 %661 }
 0x766   :  { %v664_v43 = vadd.f32 %v662_v42, %v658_v41 }
 0x768   :  { %2696 = vtanh.f32 %v664_v43 }
 0x772   :  { %v2697_v47 = vpop.eup %2696 }
 0x773   :  { %v666_v48 = vmul.f32 %v2697_v47, %v2695_v44 }
 0x775   :  { %668 = vrot.lane.b32.xlu1 %v666_v48, %s2895_s3 }
 0x7e7   :  { %v669_v49 = vpop.permute.xlu1 %668 }
 0x7e8   :  { %671 = vst.msk [vmem:[#allocation3 + $0x18] sm:$0xff] %vm256_vm1, %v669_v49  ;;  %2221 = vmatmul.mubr.msk.f32.vlgmr.msra.gmra.mrb[8].mxu0 %vm256_vm1, %v669_v49 }
 0x7e9   :  { %2377 = vmatpush1.bf16.msra.mxu0 %v3001_v10  ;;  %844 = vmatprep.mubr.f32.mxu0 %v2894_v1 }
 0x7ea   :  { %2379 = vmatprep.subr.bf16.mxu0 %v3017_v15 }
 0x7ed   :  { %2381 = vmatpush1.bf16.msra.mxu0 %v3023_v17 }
 0x7ee   :  { %2383 = vmatprep.subr.bf16.mxu0 %v3032_v20 }
 0x7ef   :  { %v1091_v50 = vld [vmem:[#allocation3 + $0x18] sm:$0xff] }
 0x7f0   :  { %2236 = vmatmul.mubr.msk.f32.gmra.mrb[6].mxu1 %vm256_vm1, %v1091_v50 }
 0x7f1   :  { %2385 = vmatpush1.bf16.msra.mxu0 %v3052_v26  ;;  %1236 = vmatprep.mubr.f32.mxu1 %v2894_v1 }
 0x7f2   :  { %2387 = vmatprep.subr.bf16.mxu0 %v3055_v27 }
 0x7f5   :  { %2389 = vmatpush1.bf16.msra.mxu0 %v3069_v31 }
 0x7f6   :  { %2391 = vmatprep.subr.bf16.mxu0 %v2995_v8 }
 0x8bb   :  { %v742_v51 = vpop.f32.mrb[8].mxu0 }
 0x8bc   :  { %v2586_v52 = vadd.f32 %v742_v51, %v3114_v40  ;;  %v744_v53 = vpop.f32.mrb[9].mxu0 }
 0x8bd   :  { %v2587_v55 = vadd.f32 %v744_v53, %v3120_v46 }
 0x8be   :  { %v2222_v54 = vmul.f32 -1.442695, %v2586_v52 }
 0x8bf   :  { %v2223_v61 = vmul.f32 -1.442695, %v2587_v55 }
 0x8c0   :  { %2698 = vpow2.f32 %v2222_v54 }
 0x8c1   :  { %2700 = vtanh.f32 %v2587_v55 }
 0x8ca   :  { %v2699_v56 = vpop.eup %2698 }
 0x8cb   :  { %v752_v57 = vadd.f32 1.0, %v2699_v56  ;;  %v2701_v58 = vpop.eup %2700 }
 0x8cd   :  { %2702 = vrcp.f32 %v752_v57 }
 0x8ce   :  { %2704 = vpow2.f32 %v2223_v61 }
 0x8d7   :  { %v2703_v59 = vpop.eup %2702 }
 0x8d8   :  { %v763_v60 = vmul.f32 %v2703_v59, %v2701_v58  ;;  %v2705_v62 = vpop.eup %2704  ;;  %v762_v0 = vmul.f32 %v2703_v59, %v664_v43 }
 0x8d9   :  { %v759_v63 = vadd.f32 1.0, %v2705_v62 }
 0x8da   :  { %765 = vrot.lane.b32.xlu0 %v763_v60, %s2895_s3 }
 0x8db   :  { %2706 = vrcp.f32 %v759_v63 }
 0x8e5   :  { %v2707_v4 = vpop.eup %2706 }
 0x94c   :  { %v766_v2 = vpop.permute.xlu0 %765 }
 0x94d   :  { %v768_v3 = vadd.f32 %v766_v2, %v762_v0 }
 0x94f   :  { %2708 = vtanh.f32 %v768_v3 }
 0x959   :  { %v2709_v5 = vpop.eup %2708 }
 0x95a   :  { %v770_v6 = vmul.f32 %v2709_v5, %v2707_v4  ;;  %v1280_v4 = vld [vmem:[#allocation7 + $0x18] sm:$0xff]  ;;  %v1277_v5 = vld [vmem:[#allocation7] sm:$0xff] }
 0x95c   :  { %772 = vrot.lane.b32.xlu1 %v770_v6, %s2895_s3 }
 0x9ce   :  { %v773_v7 = vpop.permute.xlu1 %772 }
 0x9cf   :  { %775 = vst.msk [vmem:[#allocation3 + $0x20] sm:$0xff] %vm256_vm1, %v773_v7  ;;  %2224 = vmatmul.mubr.msk.f32.vlgmr.msra.gmra.mrb[10].mxu0 %vm256_vm1, %v773_v7  ;;  %v1282_v7 = vld [vmem:[#allocation7 + $0x28] sm:$0xff] }
 0x9d0   :  { %2393 = vmatpush1.bf16.msra.mxu0 %v3001_v10  ;;  %948 = vmatprep.mubr.f32.mxu0 %v2894_v1 }
 0x9d1   :  { %2395 = vmatprep.subr.bf16.mxu0 %v3017_v15 }
 0x9d4   :  { %2397 = vmatpush1.bf16.msra.mxu0 %v3023_v17 }
 0x9d5   :  { %2399 = vmatprep.subr.bf16.mxu0 %v3032_v20 }
 0x9d6   :  { %v1092_v9 = vld [vmem:[#allocation3 + $0x20] sm:$0xff] }
 0x9d7   :  { %2237 = vmatmul.mubr.msk.f32.gmra.mrb[8].mxu1 %vm256_vm1, %v1092_v9  ;;  %v1284_v9 = vld [vmem:[#allocation7 + $0x38] sm:$0xff] }
 0x9d8   :  { %2401 = vmatpush1.bf16.msra.mxu0 %v3052_v26  ;;  %1242 = vmatprep.mubr.f32.mxu1 %v2894_v1 }
 0x9d9   :  { %2403 = vmatprep.subr.bf16.mxu0 %v3055_v27 }
 0x9dc   :  { %2405 = vmatpush1.bf16.msra.mxu0 %v3069_v31 }
 0x9dd   :  { %2407 = vmatprep.subr.bf16.mxu0 %v2995_v8 }
 0xaa2   :  { %v846_v11 = vpop.f32.mrb[10].mxu0 }
 0xaa3   :  { %v2588_v12 = vadd.f32 %v846_v11, %v3114_v40  ;;  %v848_v13 = vpop.f32.mrb[11].mxu0 }
 0xaa4   :  { %v2589_v16 = vadd.f32 %v848_v13, %v3120_v46  ;;  %v1283_v13 = vld [vmem:[#allocation7 + $0x30] sm:$0xff] }
 0xaa5   :  { %v2225_v14 = vmul.f32 -1.442695, %v2588_v12  ;;  %v1281_v12 = vld [vmem:[#allocation7 + $0x20] sm:$0xff] }
 0xaa6   :  { %v2226_v24 = vmul.f32 -1.442695, %v2589_v16 }
 0xaa7   :  { %2710 = vpow2.f32 %v2225_v14  ;;  %v1286_v14 = vld [vmem:[#allocation7 + $0x48] sm:$0xff] }
 0xaa8   :  { %2712 = vtanh.f32 %v2589_v16  ;;  %v1288_v16 = vld [vmem:[#allocation7 + $0x58] sm:$0xff] }
 0xab1   :  { %v2711_v18 = vpop.eup %2710 }
 0xab2   :  { %v856_v19 = vadd.f32 1.0, %v2711_v18  ;;  %v2713_v21 = vpop.eup %2712  ;;  %v3241_v18 = vpack.c.bf16 %v1283_v13, %v1281_v12 }
 0xab4   :  { %2714 = vrcp.f32 %v856_v19  ;;  %v3244_v19 = vpack.c.bf16 %v1288_v16, %v1286_v14 }
 0xab5   :  { %2716 = vpow2.f32 %v2226_v24 }
 0xabe   :  { %v2715_v22 = vpop.eup %2714 }
 0xabf   :  { %v867_v23 = vmul.f32 %v2715_v22, %v2713_v21  ;;  %v2717_v8 = vpop.eup %2716  ;;  %v866_v28 = vmul.f32 %v2715_v22, %v768_v3  ;;  %v1278_v3 = vld [vmem:[#allocation7 + $0x8] sm:$0xff]  ;;  %v1285_v21 = vld [vmem:[#allocation7 + $0x40] sm:$0xff]  ;;  %v1287_v22 = vld [vmem:[#allocation7 + $0x50] sm:$0xff] }
 0xac0   :  { %v863_v25 = vadd.f32 1.0, %v2717_v8  ;;  %v3233_v6 = vpack.c.bf16 %v1280_v4, %v1278_v3 }
 0xac1   :  { %869 = vrot.lane.b32.xlu0 %v867_v23, %s2895_s3  ;;  %v3247_v23 = vpack.c.bf16 %v1287_v22, %v1285_v21 }
 0xac2   :  { %2718 = vrcp.f32 %v863_v25  ;;  %2439 = vmatprep.subr.bf16.mxu1 %v3233_v6 }
 0xacc   :  { %v2719_v32 = vpop.eup %2718 }
 0xb33   :  { %v870_v29 = vpop.permute.xlu0 %869 }
 0xb34   :  { %v872_v30 = vadd.f32 %v870_v29, %v866_v28 }
 0xb36   :  { %2720 = vtanh.f32 %v872_v30 }
 0xb40   :  { %v2721_v33 = vpop.eup %2720 }
 0xb41   :  { %v874_v34 = vmul.f32 %v2721_v33, %v2719_v32  ;;  %v1290_v32 = vld [vmem:[#allocation7 + $0x68] sm:$0xff]  ;;  %v1292_v33 = vld [vmem:[#allocation7 + $0x78] sm:$0xff] }
 0xb43   :  { %876 = vrot.lane.b32.xlu1 %v874_v34, %s2895_s3  ;;  %v1289_v34 = vld [vmem:[#allocation7 + $0x60] sm:$0xff] }
 0xbb5   :  { %v877_v35 = vpop.permute.xlu1 %876 }
 0xbb6   :  { %879 = vst.msk [vmem:[#allocation3 + $0x28] sm:$0xff] %vm256_vm1, %v877_v35  ;;  %2227 = vmatmul.mubr.msk.f32.vlgmr.msra.gmra.mrb[12].mxu0 %vm256_vm1, %v877_v35  ;;  %v3251_v35 = vpack.c.bf16 %v1292_v33, %v1290_v32 }
 0xbb7   :  { %2409 = vmatpush1.bf16.msra.mxu0 %v3001_v10  ;;  %1052 = vmatprep.mubr.f32.mxu0 %v2894_v1 }
 0xbb8   :  { %2411 = vmatprep.subr.bf16.mxu0 %v3017_v15 }
 0xbbb   :  { %2413 = vmatpush1.bf16.msra.mxu0 %v3023_v17 }
 0xbbc   :  { %2415 = vmatprep.subr.bf16.mxu0 %v3032_v20 }
 0xbbd   :  { %v1093_v36 = vld [vmem:[#allocation3 + $0x28] sm:$0xff] }
 0xbbe   :  { %2238 = vmatmul.mubr.msk.f32.gmra.mrb[10].mxu1 %vm256_vm1, %v1093_v36  ;;  %v1291_v36 = vld [vmem:[#allocation7 + $0x70] sm:$0xff] }
 0xbbf   :  { %2417 = vmatpush1.bf16.msra.mxu0 %v3052_v26  ;;  %1248 = vmatprep.mubr.f32.mxu1 %v2894_v1 }
 0xbc0   :  { %2419 = vmatprep.subr.bf16.mxu0 %v3055_v27 }
 0xbc3   :  { %2421 = vmatpush1.bf16.msra.mxu0 %v3069_v31 }
 0xc89   :  { %v950_v10 = vpop.f32.mrb[12].mxu0 }
 0xc8a   :  { %v2590_v39 = vadd.f32 %v950_v10, %v3114_v40  ;;  %v952_v41 = vpop.f32.mrb[13].mxu0  ;;  %v3253_v10 = vpack.c.bf16 %v1291_v36, %v1289_v34 }
 0xc8b   :  { %v2591_v17 = vadd.f32 %v952_v41, %v3120_v46 }
 0xc8c   :  { %v2228_v15 = vmul.f32 -1.442695, %v2590_v39 }
 0xc8d   :  { %v2229_v27 = vmul.f32 -1.442695, %v2591_v17 }
 0xc8e   :  { %2722 = vpow2.f32 %v2228_v15 }
 0xc8f   :  { %2724 = vtanh.f32 %v2591_v17 }
 0xc98   :  { %v2723_v20 = vpop.eup %2722 }
 0xc99   :  { %v960_v42 = vadd.f32 1.0, %v2723_v20  ;;  %v2725_v43 = vpop.eup %2724 }
 0xc9b   :  { %2726 = vrcp.f32 %v960_v42  ;;  %v1112_v42 = vld [vmem:[%s3410_s6] sm:$0x3] }
 0xc9c   :  { %2728 = vpow2.f32 %v2229_v27 }
 0xca5   :  { %v2727_v26 = vpop.eup %2726 }
 0xca6   :  { %v971_v44 = vmul.f32 %v2727_v26, %v2725_v43  ;;  %v2729_v31 = vpop.eup %2728  ;;  %v970_v48 = vmul.f32 %v2727_v26, %v872_v30  ;;  %v3277_v43 = vrot.slane %v1112_v42, %v76_v38 }
 0xca7   :  { %v967_v47 = vadd.f32 1.0, %v2729_v31 }
 0xca8   :  { %973 = vrot.lane.b32.xlu0 %v971_v44, %s2895_s3 }
 0xca9   :  { %2730 = vrcp.f32 %v967_v47  ;;  %v3282_v47 = vrot.slane %v1112_v42, %v80_v45 }
 0xcb3   :  { %v2731_v51 = vpop.eup %2730 }
 0xd1a   :  { %v974_v49 = vpop.permute.xlu0 %973 }
 0xd1b   :  { %v976_v50 = vadd.f32 %v974_v49, %v970_v48 }
 0xd1d   :  { %2732 = vtanh.f32 %v976_v50 }
 0xd27   :  { %v2733_v52 = vpop.eup %2732 }
 0xd28   :  { %v978_v53 = vmul.f32 %v2733_v52, %v2731_v51 }
 0xd2a   :  { %980 = vrot.lane.b32.xlu1 %v978_v53, %s2895_s3 }
 0xd9c   :  { %v981_v54 = vpop.permute.xlu1 %980 }
 0xd9d   :  { %983 = vst.msk [vmem:[#allocation3 + $0x30] sm:$0xff] %vm256_vm1, %v981_v54  ;;  %2230 = vmatmul.mubr.msk.f32.vlgmr.msra.gmra.mrb[14].mxu0 %vm256_vm1, %v981_v54 }
 0xd9e   :  { %2291 = vmatprep.mubr.msk.f32.mxu0 %vm2897_vm2, %v2894_v1 }
 0xda4   :  { %v1094_v55 = vld [vmem:[#allocation3 + $0x30] sm:$0xff] }
 0xda5   :  { %2239 = vmatmul.mubr.msk.f32.gmra.mrb[12].mxu1 %vm256_vm1, %v1094_v55 }
 0xda6   :  { %1254 = vmatprep.mubr.f32.mxu1 %v2894_v1 }
 0xe70   :  { %v1054_v56 = vpop.f32.mrb[14].mxu0 }
 0xe71   :  { %v2592_v57 = vadd.f32 %v1054_v56, %v3114_v40  ;;  %v1056_v58 = vpop.f32.mrb[15].mxu0  ;;  %v1279_v40 = vld [vmem:[#allocation7 + $0x10] sm:$0xff] }
 0xe72   :  { %v2593_v60 = vadd.f32 %v1056_v58, %v3120_v46  ;;  %v3235_v11 = vpack.c.bf16 %v1279_v40, %v1277_v5  ;;  %v3237_v46 = vpack.c.bf16 %v1284_v9, %v1282_v7 }
 0xe73   :  { %v2231_v59 = vmul.f32 -1.442695, %v2592_v57 }
 0xe74   :  { %2441 = vmatpush1.bf16.msra.mxu1 %v3235_v11  ;;  %v2232_v24 = vmul.f32 -1.442695, %v2593_v60 }
 0xe75   :  { %2734 = vpow2.f32 %v2231_v59  ;;  %2443 = vmatprep.subr.bf16.mxu1 %v3237_v46 }
 0xe76   :  { %2736 = vtanh.f32 %v2593_v60 }
 0xe78   :  { %2445 = vmatpush1.bf16.msra.mxu1 %v3241_v18 }
 0xe79   :  { %2447 = vmatprep.subr.bf16.mxu1 %v3244_v19 }
 0xe7c   :  { %2449 = vmatpush1.bf16.msra.mxu1 %v3247_v23 }
 0xe7d   :  { %2451 = vmatprep.subr.bf16.mxu1 %v3251_v35 }
 0xe7f   :  { %v2735_v61 = vpop.eup %2734 }
 0xe80   :  { %v1064_v62 = vadd.f32 1.0, %v2735_v61  ;;  %v2737_v63 = vpop.eup %2736  ;;  %2453 = vmatpush1.bf16.msra.mxu1 %v3253_v10 }
 0xe81   :  { %2455 = vmatprep.subr.bf16.mxu1 %v3233_v6 }
 0xe82   :  { %2738 = vrcp.f32 %v1064_v62 }
 0xe83   :  { %2740 = vpow2.f32 %v2232_v24 }
 0xe8c   :  { %v2739_v0 = vpop.eup %2738 }
 0xe8d   :  { %v1075_v2 = vmul.f32 %v2739_v0, %v2737_v63  ;;  %v2741_v8 = vpop.eup %2740  ;;  %v1074_v28 = vmul.f32 %v2739_v0, %v976_v50 }
 0xe8e   :  { %v1071_v25 = vadd.f32 1.0, %v2741_v8 }
 0xe8f   :  { %1077 = vrot.lane.b32.xlu0 %v1075_v2, %s2895_s3 }
 0xe90   :  { %2742 = vrcp.f32 %v1071_v25 }
 0xe9a   :  { %v2743_v39 = vpop.eup %2742 }
 0xf01   :  { %v1078_v29 = vpop.permute.xlu0 %1077 }
 0xf02   :  { %v1080_v30 = vadd.f32 %v1078_v29, %v1074_v28 }
 0xf04   :  { %2744 = vtanh.f32 %v1080_v30 }
 0xf0e   :  { %v2745_v41 = vpop.eup %2744 }
 0xf0f   :  { %v1082_v15 = vmul.f32 %v2745_v41, %v2743_v39 }
 0xf11   :  { %1084 = vrot.lane.b32.xlu1 %v1082_v15, %s2895_s3 }
 0xf83   :  { %v1085_v17 = vpop.permute.xlu1 %1084 }
 0xf84   :  { %1087 = vst.msk [vmem:[#allocation3 + $0x38] sm:$0xff] %vm256_vm1, %v1085_v17 }
 0xf8b   :  { %v1095_v20 = vld [vmem:[#allocation3 + $0x38] sm:$0xff] }
 0xf8c   :  { %2240 = vmatmul.mubr.msk.f32.gmra.mrb[14].mxu1 %vm256_vm1, %v1095_v20 }
 0xf8d   :  { %1359 = vmatprep.mubr.f32.mxu1 %v2894_v1 }
 0xf90   :  { %1360 = vmatmul.mubr.f32.vlgmr.msra.gmra.mrb[0].mxu1 %v2894_v1 }
 0xf91   :  { %2457 = vmatpush1.bf16.msra.mxu1 %v3235_v11  ;;  %1461 = vmatprep.mubr.f32.mxu1 %v2894_v1 }
 0xf92   :  { %2459 = vmatprep.subr.bf16.mxu1 %v3237_v46 }
 0xf95   :  { %2461 = vmatpush1.bf16.msra.mxu1 %v3241_v18 }
 0xf96   :  { %2463 = vmatprep.subr.bf16.mxu1 %v3244_v19 }
 0xf99   :  { %2465 = vmatpush1.bf16.msra.mxu1 %v3247_v23 }
 0xf9a   :  { %2467 = vmatprep.subr.bf16.mxu1 %v3251_v35 }
 0xf9d   :  { %2469 = vmatpush1.bf16.msra.mxu1 %v3253_v10 }
 0xf9e   :  { %2471 = vmatprep.subr.bf16.mxu1 %v3233_v6 }
0x1063   :  { %v1361_v26 = vpop.f32.mrb[0].mxu1 }
0x1064   :  { %v2594_v44 = vadd.f32 %v1361_v26, %v3277_v43  ;;  %v1363_v27 = vpop.f32.mrb[1].mxu1 }
0x1065   :  { %v2595_v48 = vadd.f32 %v1363_v27, %v3282_v47 }
0x1066   :  { %v2241_v31 = vmul.f32 -1.442695, %v2594_v44 }
0x1067   :  { %v2242_v53 = vmul.f32 -1.442695, %v2595_v48 }
0x1068   :  { %2746 = vpow2.f32 %v2241_v31 }
0x1069   :  { %2748 = vtanh.f32 %v2595_v48 }
0x1072   :  { %v2747_v49 = vpop.eup %2746 }
0x1073   :  { %v1371_v50 = vadd.f32 1.0, %v2747_v49  ;;  %v2749_v51 = vpop.eup %2748 }
0x1075   :  { %2750 = vrcp.f32 %v1371_v50 }
0x1076   :  { %2752 = vpow2.f32 %v2242_v53 }
0x107f   :  { %v2751_v52 = vpop.eup %2750 }
0x1080   :  { %v1382_v38 = vmul.f32 %v2751_v52, %v2749_v51  ;;  %v2753_v54 = vpop.eup %2752  ;;  %v1381_v56 = vmul.f32 0.0, %v2751_v52 }
0x1081   :  { %v1378_v55 = vadd.f32 1.0, %v2753_v54 }
0x1082   :  { %1384 = vrot.lane.b32.xlu0 %v1382_v38, %s2895_s3 }
0x1083   :  { %2754 = vrcp.f32 %v1378_v55 }
0x108d   :  { %v2755_v45 = vpop.eup %2754 }
0x10f4   :  { %v1385_v57 = vpop.permute.xlu0 %1384 }
0x10f5   :  { %v1387_v37 = vadd.f32 %v1385_v57, %v1381_v56 }
0x10f7   :  { %2756 = vtanh.f32 %v1387_v37 }
0x1101   :  { %v2757_v58 = vpop.eup %2756 }
0x1102   :  { %v1389_v59 = vmul.f32 %v2757_v58, %v2755_v45 }
0x1104   :  { %1393 = vrot.lane.b32.xlu1 %v1389_v59, %s2895_s3 }
0x1176   :  { %v1394_v60 = vpop.permute.xlu1 %1393 }
0x1177   :  { %2243 = vmatmul.mubr.msk.f32.vlgmr.msra.gmra.mrb[2].mxu1 %vm256_vm1, %v1394_v60 }
0x1178   :  { %2473 = vmatpush1.bf16.msra.mxu1 %v3235_v11  ;;  %1563 = vmatprep.mubr.f32.mxu1 %v2894_v1 }
0x1179   :  { %2475 = vmatprep.subr.bf16.mxu1 %v3237_v46 }
0x117c   :  { %2477 = vmatpush1.bf16.msra.mxu1 %v3241_v18 }
0x117d   :  { %2479 = vmatprep.subr.bf16.mxu1 %v3244_v19 }
0x1180   :  { %2481 = vmatpush1.bf16.msra.mxu1 %v3247_v23 }
0x1181   :  { %2483 = vmatprep.subr.bf16.mxu1 %v3251_v35 }
0x1184   :  { %2485 = vmatpush1.bf16.msra.mxu1 %v3253_v10 }
0x1185   :  { %2487 = vmatprep.subr.bf16.mxu1 %v3233_v6 }
0x124a   :  { %v1463_v61 = vpop.f32.mrb[2].mxu1 }
0x124b   :  { %v2596_v62 = vadd.f32 %v1463_v61, %v3277_v43  ;;  %v1465_v63 = vpop.f32.mrb[3].mxu1 }
0x124c   :  { %v2597_v2 = vadd.f32 %v1465_v63, %v3282_v47 }
0x124d   :  { %v2244_v0 = vmul.f32 -1.442695, %v2596_v62 }
0x124e   :  { %v2245_v9 = vmul.f32 -1.442695, %v2597_v2 }
0x124f   :  { %2758 = vpow2.f32 %v2244_v0 }
0x1250   :  { %2760 = vtanh.f32 %v2597_v2 }
0x1259   :  { %v2759_v3 = vpop.eup %2758 }
0x125a   :  { %v1473_v4 = vadd.f32 1.0, %v2759_v3  ;;  %v2761_v5 = vpop.eup %2760 }
0x125c   :  { %2762 = vrcp.f32 %v1473_v4 }
0x125d   :  { %2764 = vpow2.f32 %v2245_v9 }
0x1266   :  { %v2763_v40 = vpop.eup %2762 }
0x1267   :  { %v1484_v7 = vmul.f32 %v2763_v40, %v2761_v5  ;;  %v2765_v12 = vpop.eup %2764  ;;  %v1483_v14 = vmul.f32 %v2763_v40, %v1387_v37 }
0x1268   :  { %v1480_v13 = vadd.f32 1.0, %v2765_v12 }
0x1269   :  { %1486 = vrot.lane.b32.xlu0 %v1484_v7, %s2895_s3 }
0x126a   :  { %2766 = vrcp.f32 %v1480_v13 }
0x1274   :  { %v2767_v22 = vpop.eup %2766 }
0x12db   :  { %v1487_v16 = vpop.permute.xlu0 %1486 }
0x12dc   :  { %v1489_v21 = vadd.f32 %v1487_v16, %v1483_v14 }
0x12de   :  { %2768 = vtanh.f32 %v1489_v21 }
0x12e8   :  { %v2769_v24 = vpop.eup %2768 }
0x12e9   :  { %v1491_v8 = vmul.f32 %v2769_v24, %v2767_v22 }
0x12eb   :  { %1495 = vrot.lane.b32.xlu1 %v1491_v8, %s2895_s3 }
0x135d   :  { %v1496_v25 = vpop.permute.xlu1 %1495 }
0x135e   :  { %2246 = vmatmul.mubr.msk.f32.vlgmr.msra.gmra.mrb[4].mxu1 %vm256_vm1, %v1496_v25 }
0x135f   :  { %2489 = vmatpush1.bf16.msra.mxu1 %v3235_v11  ;;  %1665 = vmatprep.mubr.f32.mxu1 %v2894_v1 }
0x1360   :  { %2491 = vmatprep.subr.bf16.mxu1 %v3237_v46 }
0x1363   :  { %2493 = vmatpush1.bf16.msra.mxu1 %v3241_v18 }
0x1364   :  { %2495 = vmatprep.subr.bf16.mxu1 %v3244_v19 }
0x1367   :  { %2497 = vmatpush1.bf16.msra.mxu1 %v3247_v23 }
0x1368   :  { %2499 = vmatprep.subr.bf16.mxu1 %v3251_v35 }
0x136b   :  { %2501 = vmatpush1.bf16.msra.mxu1 %v3253_v10 }
0x136c   :  { %2503 = vmatprep.subr.bf16.mxu1 %v3233_v6 }
0x1431   :  { %v1565_v28 = vpop.f32.mrb[4].mxu1 }
0x1432   :  { %v2598_v29 = vadd.f32 %v1565_v28, %v3277_v43  ;;  %v1567_v30 = vpop.f32.mrb[5].mxu1 }
0x1433   :  { %v2599_v33 = vadd.f32 %v1567_v30, %v3282_v47 }
0x1434   :  { %v2247_v32 = vmul.f32 -1.442695, %v2598_v29 }
0x1435   :  { %v2248_v17 = vmul.f32 -1.442695, %v2599_v33 }
0x1436   :  { %2770 = vpow2.f32 %v2247_v32 }
0x1437   :  { %2772 = vtanh.f32 %v2599_v33 }
0x1440   :  { %v2771_v34 = vpop.eup %2770 }
0x1441   :  { %v1575_v36 = vadd.f32 1.0, %v2771_v34  ;;  %v2773_v39 = vpop.eup %2772 }
0x1443   :  { %2774 = vrcp.f32 %v1575_v36 }
0x1444   :  { %2776 = vpow2.f32 %v2248_v17 }
0x144d   :  { %v2775_v41 = vpop.eup %2774 }
0x144e   :  { %v1586_v15 = vmul.f32 %v2775_v41, %v2773_v39  ;;  %v2777_v20 = vpop.eup %2776  ;;  %v1585_v26 = vmul.f32 %v2775_v41, %v1489_v21 }
0x144f   :  { %v1582_v42 = vadd.f32 1.0, %v2777_v20 }
0x1450   :  { %1588 = vrot.lane.b32.xlu0 %v1586_v15, %s2895_s3 }
0x1451   :  { %2778 = vrcp.f32 %v1582_v42 }
0x145b   :  { %v2779_v31 = vpop.eup %2778 }
0x14c2   :  { %v1589_v44 = vpop.permute.xlu0 %1588 }
0x14c3   :  { %v1591_v27 = vadd.f32 %v1589_v44, %v1585_v26 }
0x14c5   :  { %2780 = vtanh.f32 %v1591_v27 }
0x14cf   :  { %v2781_v48 = vpop.eup %2780 }
0x14d0   :  { %v1593_v49 = vmul.f32 %v2781_v48, %v2779_v31 }
0x14d2   :  { %1597 = vrot.lane.b32.xlu1 %v1593_v49, %s2895_s3 }
0x1544   :  { %v1598_v50 = vpop.permute.xlu1 %1597 }
0x1545   :  { %2249 = vmatmul.mubr.msk.f32.vlgmr.msra.gmra.mrb[6].mxu1 %vm256_vm1, %v1598_v50 }
0x1546   :  { %2505 = vmatpush1.bf16.msra.mxu1 %v3235_v11  ;;  %1767 = vmatprep.mubr.f32.mxu1 %v2894_v1 }
0x1547   :  { %2507 = vmatprep.subr.bf16.mxu1 %v3237_v46 }
0x154a   :  { %2509 = vmatpush1.bf16.msra.mxu1 %v3241_v18 }
0x154b   :  { %2511 = vmatprep.subr.bf16.mxu1 %v3244_v19 }
0x154e   :  { %2513 = vmatpush1.bf16.msra.mxu1 %v3247_v23 }
0x154f   :  { %2515 = vmatprep.subr.bf16.mxu1 %v3251_v35 }
0x1552   :  { %2517 = vmatpush1.bf16.msra.mxu1 %v3253_v10 }
0x1553   :  { %2519 = vmatprep.subr.bf16.mxu1 %v3233_v6 }
0x1618   :  { %v1667_v51 = vpop.f32.mrb[6].mxu1 }
0x1619   :  { %v2600_v52 = vadd.f32 %v1667_v51, %v3277_v43  ;;  %v1669_v38 = vpop.f32.mrb[7].mxu1 }
0x161a   :  { %v2601_v54 = vadd.f32 %v1669_v38, %v3282_v47 }
0x161b   :  { %v2250_v53 = vmul.f32 -1.442695, %v2600_v52 }
0x161c   :  { %v2251_v58 = vmul.f32 -1.442695, %v2601_v54 }
0x161d   :  { %2782 = vpow2.f32 %v2250_v53 }
0x161e   :  { %2784 = vtanh.f32 %v2601_v54 }
0x1627   :  { %v2783_v55 = vpop.eup %2782 }
0x1628   :  { %v1677_v56 = vadd.f32 1.0, %v2783_v55  ;;  %v2785_v57 = vpop.eup %2784 }
0x162a   :  { %2786 = vrcp.f32 %v1677_v56 }
0x162b   :  { %2788 = vpow2.f32 %v2251_v58 }
0x1634   :  { %v2787_v37 = vpop.eup %2786 }
0x1635   :  { %v1688_v45 = vmul.f32 %v2787_v37, %v2785_v57  ;;  %v2789_v59 = vpop.eup %2788  ;;  %v1687_v61 = vmul.f32 %v2787_v37, %v1591_v27 }
0x1636   :  { %v1684_v60 = vadd.f32 1.0, %v2789_v59 }
0x1637   :  { %1690 = vrot.lane.b32.xlu0 %v1688_v45, %s2895_s3 }
0x1638   :  { %2790 = vrcp.f32 %v1684_v60 }
0x1642   :  { %v2791_v0 = vpop.eup %2790 }
0x16a9   :  { %v1691_v62 = vpop.permute.xlu0 %1690 }
0x16aa   :  { %v1693_v63 = vadd.f32 %v1691_v62, %v1687_v61 }
0x16ac   :  { %2792 = vtanh.f32 %v1693_v63 }
0x16b6   :  { %v2793_v2 = vpop.eup %2792 }
0x16b7   :  { %v1695_v3 = vmul.f32 %v2793_v2, %v2791_v0 }
0x16b9   :  { %1699 = vrot.lane.b32.xlu1 %v1695_v3, %s2895_s3 }
0x172b   :  { %v1700_v4 = vpop.permute.xlu1 %1699 }
0x172c   :  { %2252 = vmatmul.mubr.msk.f32.vlgmr.msra.gmra.mrb[8].mxu1 %vm256_vm1, %v1700_v4 }
0x172d   :  { %2521 = vmatpush1.bf16.msra.mxu1 %v3235_v11  ;;  %1869 = vmatprep.mubr.f32.mxu1 %v2894_v1 }
0x172e   :  { %2523 = vmatprep.subr.bf16.mxu1 %v3237_v46 }
0x1731   :  { %2525 = vmatpush1.bf16.msra.mxu1 %v3241_v18 }
0x1732   :  { %2527 = vmatprep.subr.bf16.mxu1 %v3244_v19 }
0x1735   :  { %2529 = vmatpush1.bf16.msra.mxu1 %v3247_v23 }
0x1736   :  { %2531 = vmatprep.subr.bf16.mxu1 %v3251_v35 }
0x1739   :  { %2533 = vmatpush1.bf16.msra.mxu1 %v3253_v10 }
0x173a   :  { %2535 = vmatprep.subr.bf16.mxu1 %v3233_v6 }
0x17ff   :  { %v1769_v5 = vpop.f32.mrb[8].mxu1 }
0x1800   :  { %v2602_v40 = vadd.f32 %v1769_v5, %v3277_v43  ;;  %v1771_v7 = vpop.f32.mrb[9].mxu1 }
0x1801   :  { %v2603_v12 = vadd.f32 %v1771_v7, %v3282_v47 }
0x1802   :  { %v2253_v9 = vmul.f32 -1.442695, %v2602_v40 }
0x1803   :  { %v2254_v24 = vmul.f32 -1.442695, %v2603_v12 }
0x1804   :  { %2794 = vpow2.f32 %v2253_v9 }
0x1805   :  { %2796 = vtanh.f32 %v2603_v12 }
0x180e   :  { %v2795_v13 = vpop.eup %2794 }
0x180f   :  { %v1779_v14 = vadd.f32 1.0, %v2795_v13  ;;  %v2797_v16 = vpop.eup %2796 }
0x1811   :  { %2798 = vrcp.f32 %v1779_v14 }
0x1812   :  { %2800 = vpow2.f32 %v2254_v24  ;;  %v2896_v24 = vmov 0.0|0.0  }
0x1813   :  { %2566 = vmatprep.subr.bf16.mxu0 %v2896_v24 }
0x181b   :  { %v2799_v21 = vpop.eup %2798 }
0x181c   :  { %v1790_v22 = vmul.f32 %v2799_v21, %v2797_v16  ;;  %v2801_v8 = vpop.eup %2800  ;;  %v1789_v28 = vmul.f32 %v2799_v21, %v1693_v63 }
0x181d   :  { %v1786_v25 = vadd.f32 1.0, %v2801_v8 }
0x181e   :  { %1792 = vrot.lane.b32.xlu0 %v1790_v22, %s2895_s3  ;;  %v2104_v22 = vld [vmem:[%s3411_s7] sm:$0xff] }
0x181f   :  { %2802 = vrcp.f32 %v1786_v25  ;;  %v2107_v25 = vld [vmem:[%s3411_s7 + $0x18] sm:$0xff] }
0x1829   :  { %v2803_v32 = vpop.eup %2802 }
0x1890   :  { %v1793_v29 = vpop.permute.xlu0 %1792 }
0x1891   :  { %v1795_v30 = vadd.f32 %v1793_v29, %v1789_v28  ;;  %v2108_v29 = vld [vmem:[%s3411_s7 + $0x20] sm:$0xff] }
0x1893   :  { %2804 = vtanh.f32 %v1795_v30 }
0x189d   :  { %v2805_v33 = vpop.eup %2804 }
0x189e   :  { %v1797_v34 = vmul.f32 %v2805_v33, %v2803_v32  ;;  %v2110_v33 = vld [vmem:[%s3411_s7 + $0x30] sm:$0xff] }
0x18a0   :  { %1801 = vrot.lane.b32.xlu1 %v1797_v34, %s2895_s3 }
0x1912   :  { %v1802_v36 = vpop.permute.xlu1 %1801 }
0x1913   :  { %2255 = vmatmul.mubr.msk.f32.vlgmr.msra.gmra.mrb[10].mxu1 %vm256_vm1, %v1802_v36 }
0x1914   :  { %2537 = vmatpush1.bf16.msra.mxu1 %v3235_v11  ;;  %1971 = vmatprep.mubr.f32.mxu1 %v2894_v1 }
0x1915   :  { %2539 = vmatprep.subr.bf16.mxu1 %v3237_v46 }
0x1918   :  { %2541 = vmatpush1.bf16.msra.mxu1 %v3241_v18 }
0x1919   :  { %2543 = vmatprep.subr.bf16.mxu1 %v3244_v19 }
0x191c   :  { %2545 = vmatpush1.bf16.msra.mxu1 %v3247_v23 }
0x191d   :  { %2547 = vmatprep.subr.bf16.mxu1 %v3251_v35 }
0x1920   :  { %2549 = vmatpush1.bf16.msra.mxu1 %v3253_v10 }
0x1921   :  { %2551 = vmatprep.subr.bf16.mxu1 %v3233_v6 }
0x19e6   :  { %v1871_v39 = vpop.f32.mrb[10].mxu1 }
0x19e7   :  { %v2604_v41 = vadd.f32 %v1871_v39, %v3277_v43  ;;  %v1873_v15 = vpop.f32.mrb[11].mxu1 }
0x19e8   :  { %v2605_v20 = vadd.f32 %v1873_v15, %v3282_v47 }
0x19e9   :  { %v2256_v17 = vmul.f32 -1.442695, %v2604_v41 }
0x19ea   :  { %v2257_v48 = vmul.f32 -1.442695, %v2605_v20 }
0x19eb   :  { %2806 = vpow2.f32 %v2256_v17 }
0x19ec   :  { %2808 = vtanh.f32 %v2605_v20 }
0x19f5   :  { %v2807_v42 = vpop.eup %2806 }
0x19f6   :  { %v1881_v26 = vadd.f32 1.0, %v2807_v42  ;;  %v2809_v44 = vpop.eup %2808 }
0x19f8   :  { %2810 = vrcp.f32 %v1881_v26 }
0x19f9   :  { %2812 = vpow2.f32 %v2257_v48 }
0x1a02   :  { %v2811_v27 = vpop.eup %2810 }
0x1a03   :  { %v1892_v31 = vmul.f32 %v2811_v27, %v2809_v44  ;;  %v2813_v6 = vpop.eup %2812  ;;  %v1891_v50 = vmul.f32 %v2811_v27, %v1795_v30  ;;  %v2109_v30 = vld [vmem:[%s3411_s7 + $0x28] sm:$0xff] }
0x1a04   :  { %v1888_v49 = vadd.f32 1.0, %v2813_v6  ;;  %v2573_v32 = vpack.c.bf16 %v2109_v30, %v2108_v29 }
0x1a05   :  { %1894 = vrot.lane.b32.xlu0 %v1892_v31, %s2895_s3  ;;  %v2264_v31 = vld [vmem:[#allocation4] ss:$0 sm:$0xff] }
0x1a06   :  { %2814 = vrcp.f32 %v1888_v49 }
0x1a10   :  { %v2815_v38 = vpop.eup %2814 }
0x1a77   :  { %v1895_v51 = vpop.permute.xlu0 %1894 }
0x1a78   :  { %v1897_v52 = vadd.f32 %v1895_v51, %v1891_v50 }
0x1a7a   :  { %2816 = vtanh.f32 %v1897_v52 }
0x1a84   :  { %v2817_v53 = vpop.eup %2816 }
0x1a85   :  { %v1899_v54 = vmul.f32 %v2817_v53, %v2815_v38 }
0x1a87   :  { %1903 = vrot.lane.b32.xlu1 %v1899_v54, %s2895_s3 }
0x1af9   :  { %v1904_v55 = vpop.permute.xlu1 %1903 }
0x1afa   :  { %2258 = vmatmul.mubr.msk.f32.vlgmr.msra.gmra.mrb[12].mxu1 %vm256_vm1, %v1904_v55 }
0x1afb   :  { %2553 = vmatpush1.bf16.msra.mxu1 %v3235_v11  ;;  %2073 = vmatprep.mubr.f32.mxu1 %v2894_v1  ;;  %v2111_v1 = vld [vmem:[%s3411_s7 + $0x38] sm:$0xff] }
0x1afc   :  { %2555 = vmatprep.subr.bf16.mxu1 %v3237_v46  ;;  %v2576_v34 = vpack.c.bf16 %v2111_v1, %v2110_v33 }
0x1aff   :  { %2557 = vmatpush1.bf16.msra.mxu1 %v3241_v18 }
0x1b00   :  { %2559 = vmatprep.subr.bf16.mxu1 %v3244_v19 }
0x1b03   :  { %2561 = vmatpush1.bf16.msra.mxu1 %v3247_v23 }
0x1b04   :  { %2563 = vmatprep.subr.bf16.mxu1 %v3251_v35 }
0x1b07   :  { %2565 = vmatpush1.bf16.msra.mxu1 %v3253_v10 }
0x1bcd   :  { %v1973_v56 = vpop.f32.mrb[12].mxu1 }
0x1bce   :  { %v2606_v57 = vadd.f32 %v1973_v56, %v3277_v43  ;;  %v1975_v37 = vpop.f32.mrb[13].mxu1 }
0x1bcf   :  { %v2607_v11 = vadd.f32 %v1975_v37, %v3282_v47 }
0x1bd0   :  { %v2259_v45 = vmul.f32 -1.442695, %v2606_v57 }
0x1bd1   :  { %v2260_v23 = vmul.f32 -1.442695, %v2607_v11 }
0x1bd2   :  { %2818 = vpow2.f32 %v2259_v45 }
0x1bd3   :  { %2820 = vtanh.f32 %v2607_v11 }
0x1bdc   :  { %v2819_v58 = vpop.eup %2818 }
0x1bdd   :  { %v1983_v46 = vadd.f32 1.0, %v2819_v58  ;;  %v2821_v18 = vpop.eup %2820 }
0x1bdf   :  { %2822 = vrcp.f32 %v1983_v46 }
0x1be0   :  { %2824 = vpow2.f32 %v2260_v23 }
0x1be9   :  { %v2823_v19 = vpop.eup %2822 }
0x1bea   :  { %v1994_v59 = vmul.f32 %v2823_v19, %v2821_v18  ;;  %v2825_v35 = vpop.eup %2824  ;;  %v1993_v60 = vmul.f32 %v2823_v19, %v1897_v52 }
0x1beb   :  { %v1990_v10 = vadd.f32 1.0, %v2825_v35 }
0x1bec   :  { %1996 = vrot.lane.b32.xlu0 %v1994_v59, %s2895_s3 }
0x1bed   :  { %2826 = vrcp.f32 %v1990_v10 }
0x1bf7   :  { %v2827_v63 = vpop.eup %2826 }
0x1c5e   :  { %v1997_v61 = vpop.permute.xlu0 %1996 }
0x1c5f   :  { %v1999_v62 = vadd.f32 %v1997_v61, %v1993_v60 }
0x1c61   :  { %2828 = vtanh.f32 %v1999_v62 }
0x1c6b   :  { %v2829_v0 = vpop.eup %2828 }
0x1c6c   :  { %v2001_v2 = vmul.f32 %v2829_v0, %v2827_v63 }
0x1c6e   :  { %2005 = vrot.lane.b32.xlu1 %v2001_v2, %s2895_s3 }
0x1ce0   :  { %v2006_v3 = vpop.permute.xlu1 %2005 }
0x1ce1   :  { %2261 = vmatmul.mubr.msk.f32.vlgmr.msra.gmra.mrb[14].mxu1 %vm256_vm1, %v2006_v3 }
0x1db4   :  { %v2075_v4 = vpop.f32.mrb[14].mxu1 }
0x1db5   :  { %v2608_v5 = vadd.f32 %v2075_v4, %v3277_v43  ;;  %v2077_v40 = vpop.f32.mrb[15].mxu1  ;;  %v2105_v43 = vld [vmem:[%s3411_s7 + $0x8] sm:$0xff] }
0x1db6   :  { %v2609_v9 = vadd.f32 %v2077_v40, %v3282_v47  ;;  %v2106_v47 = vld [vmem:[%s3411_s7 + $0x10] sm:$0xff]  ;;  %v2567_v8 = vpack.c.bf16 %v2105_v43, %v2104_v22 }
0x1db7   :  { %v2262_v7 = vmul.f32 -1.442695, %v2608_v5  ;;  %v2570_v28 = vpack.c.bf16 %v2107_v25, %v2106_v47 }
0x1db8   :  { %2568 = vmatpush3.bf16.msra.mxu0 %v2567_v8  ;;  %v2263_v36 = vmul.f32 -1.442695, %v2609_v9 }
0x1db9   :  { %2830 = vpow2.f32 %v2262_v7  ;;  %2569 = vmatprep.subr.bf16.mxu0 %v2896_v24 }
0x1dba   :  { %2832 = vtanh.f32 %v2609_v9 }
0x1dbc   :  { %2571 = vmatpush3.bf16.msra.mxu0 %v2570_v28 }
0x1dbd   :  { %2572 = vmatprep.subr.bf16.mxu0 %v2896_v24 }
0x1dc0   :  { %2574 = vmatpush3.bf16.msra.mxu0 %v2573_v32 }
0x1dc1   :  { %2575 = vmatprep.subr.bf16.mxu0 %v2896_v24 }
0x1dc3   :  { %v2831_v12 = vpop.eup %2830 }
0x1dc4   :  { %v2085_v13 = vadd.f32 1.0, %v2831_v12  ;;  %v2833_v14 = vpop.eup %2832  ;;  %2577 = vmatpush3.bf16.msra.mxu0 %v2576_v34 }
0x1dc6   :  { %2834 = vrcp.f32 %v2085_v13 }
0x1dc7   :  { %2836 = vpow2.f32 %v2263_v36 }
0x1dd0   :  { %v2835_v16 = vpop.eup %2834 }
0x1dd1   :  { %v2096_v21 = vmul.f32 %v2835_v16, %v2833_v14  ;;  %v2837_v39 = vpop.eup %2836  ;;  %v2095_v15 = vmul.f32 %v2835_v16, %v1999_v62 }
0x1dd2   :  { %v2092_v41 = vadd.f32 1.0, %v2837_v39 }
0x1dd3   :  { %2098 = vrot.lane.b32.xlu0 %v2096_v21, %s2895_s3 }
0x1dd4   :  { %2838 = vrcp.f32 %v2092_v41 }
0x1dde   :  { %v2839_v42 = vpop.eup %2838 }
0x1e45   :  { %v2099_v17 = vpop.permute.xlu0 %2098 }
0x1e46   :  { %v2101_v20 = vadd.f32 %v2099_v17, %v2095_v15 }
0x1e48   :  { %2840 = vtanh.f32 %v2101_v20 }
0x1e52   :  { %v2841_v26 = vpop.eup %2840 }
0x1e53   :  { %v2103_v44 = vmul.f32 %v2841_v26, %v2839_v42 }
0x1e55   :  { %2120 = vrot.lane.b32.xlu1 %v2103_v44, %s2895_s3 }
0x1ec7   :  { %v2121_v27 = vpop.permute.xlu1 %2120 }
0x1ec8   :  { %2292 = vmatmul.mubr.msk.f32.vlgmr.msra.gmra.mrb[16].mxu0 %vm256_vm1, %v2121_v27 }
0x1f9b   :  { %v2190_v48 = vpop.f32.mrb[16].mxu0 }
0x1f9c   :  { %v2191_v6 = vadd.f32 %v2264_v31, %v2190_v48  ;;  %v2293_v49 = vpop.f32.mrb[17].mxu0 }
0x1f9e   :  { %2195 = vst.msk [vmem:[%s3413_s9] sm:$0xff] %vm2194_vm3, %v2191_v6 }
0x1f9f   :  { %2200 = vsyncpa [#allocation6], 1 }
0x1fa0   :  { %2201 = vsyncpa [#allocation8], 1 }

</bundles_post_ra>
